<compile_context>
chip_gen: v5e
topology: v5e:2x2
jax: 0.10.0
libtpu: 0.0.40
codegen_flags: <defaults>
</compile_context>

<pallas_src>
import jax
import jax.numpy as jnp
from jax import lax
from jax.experimental import pallas as pl
from jax.experimental.pallas import tpu as pltpu

H = 10            # hidden width of fc1/fc2
LANES = 128       # TPU lane width; batch sits on this axis inside the kernel
ROW_ALIGN = 16    # row (sublane) alignment that works for both f32 and bf16 tiles


def _round_up(a, m):
    return -(-a // m) * m


def mlp_kernel(w1_ref, b1_ref, w2_ref, b2_ref, w3_ref, b3_ref, x_ref, o_ref):
    cdt = x_ref.dtype
    # One vreg per hidden channel per chunk: 8 rows for f32, 16 rows for bf16.
    rchunk = 8 if jnp.dtype(cdt).itemsize >= 4 else 16
    n_chunks = x_ref.shape[0] // rchunk

    # Read all ~121 SMEM scalars once per kernel invocation (not once per chunk).
    w1 = [w1_ref[j].astype(cdt) for j in range(H)]
    b1 = [b1_ref[j].astype(cdt) for j in range(H)]
    w2 = [[w2_ref[i, j].astype(cdt) for j in range(H)] for i in range(H)]
    b2 = [b2_ref[j].astype(cdt) for j in range(H)]
    w3 = [w3_ref[j] for j in range(H)]      # stays f32: fc3 accumulates in f32
    b3 = b3_ref[0]

    # Hoisted fc3-bias broadcast (1-2 vregs, reused by every chunk).
    b3_vec = jnp.full((rchunk, LANES), b3, jnp.float32)

    def chunk_body(c, carry):
        r = pl.multiple_of(c * rchunk, rchunk)
        x = x_ref[pl.ds(r, rchunk), :]

        # fc1 + ReLU: input feature dim is 1 -> one broadcast FMA per hidden unit.
        h1 = [jnp.maximum(x * w1[j] + b1[j], 0) for j in range(H)]

        # fc2 + ReLU with fc3 fused: only one h2 accumulator live at a time.
        out = b3_vec
        for j in range(H):
            p = [h1[i] * w2[i][j] for i in range(H)]
            while len(p) > 1:                       # tree-reduce the 10 products
                nxt = [p[k] + p[k + 1] for k in range(0, len(p) - 1, 2)]
                if len(p) % 2:
                    nxt.append(p[-1])
                p = nxt
            h2j = jnp.maximum(p[0] + b2[j], 0)
            out = out + h2j * w3[j]                 # (bf16|f32) * f32 -> f32 acc

        o_ref[pl.ds(r, rchunk), :] = out.astype(o_ref.dtype)
        return carry

    lax.fori_loop(0, n_chunks, chunk_body, 0)


def linear_regression_forward(x, params, *, tile_rows=1024,
                              compute_dtype=jnp.float32):
    """x: (B, 1) float32 (PyTorch layout). Returns (B, 1) float32.

    params: dict with
      w1 (10,), b1 (10,)      -- fc1 (in=1, out=10), weight flattened
      w2 (10,10), b2 (10,)    -- fc2, weight stored as (in, out)
      w3 (10,), b3 (1,)       -- fc3 (in=10, out=1), weight flattened
    """
    B = x.shape[0]

    rows_needed = _round_up(-(-B // LANES), ROW_ALIGN)
    tr = max(ROW_ALIGN, min((int(tile_rows) // ROW_ALIGN) * ROW_ALIGN, rows_needed))
    rows_total = _round_up(rows_needed, tr)
    num_tiles = rows_total // tr
    # v7x megacore: prefer >= 2 grid steps when there is enough work so the
    # "parallel" axis can be sharded across both TensorCores (no-op on v5e/v6e).
    if num_tiles == 1 and tr >= 2 * ROW_ALIGN:
        tr = _round_up(tr // 2, ROW_ALIGN)
        rows_total = _round_up(rows_needed, tr)
        num_tiles = rows_total // tr

    # TODO(synk): the pad/reshape below and the final slice are extra HBM passes
    # outside the kernel; they are hidden while the kernel is VALU-bound but should
    # move in-kernel (masked store on the last tile) if an MXU/bf16 formulation
    # ever approaches the HBM roofline.
    x_flat = jnp.ravel(x).astype(compute_dtype)
    x_pad = jnp.pad(x_flat, (0, rows_total * LANES - B))
    x2d = x_pad.reshape(rows_total, LANES)       # batch on the lane axis

    smem_spec = pl.BlockSpec(memory_space=pltpu.MemorySpace.SMEM)
    in_spec = pl.BlockSpec((tr, LANES), lambda i: (i, 0))
    out_spec = pl.BlockSpec((tr, LANES), lambda i: (i, 0))

    out2d = pl.pallas_call(
        mlp_kernel,
        out_shape=jax.ShapeDtypeStruct((rows_total, LANES), jnp.float32),
        grid_spec=pltpu.PrefetchScalarGridSpec(
            num_scalar_prefetch=0,
            grid=(num_tiles,),
            in_specs=[smem_spec] * 6 + [in_spec],
            out_specs=out_spec,
        ),
        compiler_params=pltpu.CompilerParams(
            dimension_semantics=("parallel",)),
    )(
        params["w1"], params["b1"],
        params["w2"], params["b2"],
        params["w3"], params["b3"],
        x2d,
    )
    return out2d.reshape(-1)[:B].reshape(B, 1)


def init_params(key):
    """Mirror nn.Linear's uniform(-1/sqrt(fan_in), 1/sqrt(fan_in)) init.
    Weights stored as (in, out) relative to PyTorch, flattened where in/out == 1."""
    ks = jax.random.split(key, 6)

    def uniform(k, shape, fan_in):
        bound = 1.0 / jnp.sqrt(jnp.float32(fan_in))
        return jax.random.uniform(k, shape, jnp.float32, -bound, bound)

    return {
        "w1": uniform(ks[0], (H,), 1),      # fc1: Linear(1, 10)
        "b1": uniform(ks[1], (H,), 1),
        "w2": uniform(ks[2], (H, H), H),    # fc2: Linear(10, 10), (in, out)
        "b2": uniform(ks[3], (H,), H),
        "w3": uniform(ks[4], (H,), H),      # fc3: Linear(10, 1)
        "b3": uniform(ks[5], (1,), H),
    }


def reference_forward(x, p):
    h1 = jnp.maximum(x * p["w1"][None, :] + p["b1"][None, :], 0.0)   # (B, 10)
    h2 = jnp.maximum(h1 @ p["w2"] + p["b2"][None, :], 0.0)           # (B, 10)
    return h2 @ p["w3"][:, None] + p["b3"][None, :]                  # (B, 1)


if __name__ == "__main__":
    key = jax.random.PRNGKey(0)
    k_x, k_p = jax.random.split(key)

    B = 3000  # not a multiple of 128: exercises the padded-tail path
    x = jax.random.normal(k_x, (B, 1), jnp.float32)
    params = init_params(k_p)
    ref = reference_forward(x, params)

    # f32 path (default; v5e-safe). Geometry here: 2 grid tiles x 2 row-chunks.
    out = jax.block_until_ready(linear_regression_forward(x, params))
    assert out.shape == (B, 1)
    err = float(jnp.max(jnp.abs(out - ref)))
    assert jnp.allclose(out, ref, atol=1e-5, rtol=1e-5), err

    # bf16 compute path (v6e/v7x option): fc1/fc2 in bf16, fc3 acc + output f32.
    out_bf16 = jax.block_until_ready(
        linear_regression_forward(x, params, compute_dtype=jnp.bfloat16))
    err_bf16 = float(jnp.max(jnp.abs(out_bf16 - ref)))
    assert err_bf16 < 0.25, err_bf16   # bf16 arithmetic: loose tolerance only

    print("KERNEL_OK")
</pallas_src>

<mosaic_0001>
module attributes {stable_mosaic.version = 11 : i64} {
  func.func @mlp_kernel(%arg0: i32, %arg1: memref<10xf32, #tpu.memory_space<smem>>, %arg2: memref<10xf32, #tpu.memory_space<smem>>, %arg3: memref<10x10xf32, #tpu.memory_space<smem>>, %arg4: memref<10xf32, #tpu.memory_space<smem>>, %arg5: memref<10xf32, #tpu.memory_space<smem>>, %arg6: memref<1xf32, #tpu.memory_space<smem>>, %arg7: memref<16x128xf32, #tpu.memory_space<vmem>>, %arg8: memref<16x128xf32, #tpu.memory_space<vmem>>) attributes {dimension_semantics = [#tpu.dimension_semantics<parallel>], iteration_bounds = array<i64: 2>, scalar_prefetch = 0 : i64, scratch_operands = 0 : i64, tpu.core_type = #tpu.core_type<tc>, window_params = [{transform_indices = @transform_0, window_bounds = array<i64: 10>}, {transform_indices = @transform_1, window_bounds = array<i64: 10>}, {transform_indices = @transform_2, window_bounds = array<i64: 10, 10>}, {transform_indices = @transform_3, window_bounds = array<i64: 10>}, {transform_indices = @transform_4, window_bounds = array<i64: 10>}, {transform_indices = @transform_5, window_bounds = array<i64: 1>}, {transform_indices = @transform_6, window_bounds = array<i64: 16, 128>}, {transform_indices = @transform_7, window_bounds = array<i64: 16, 128>}]} {
    %c0 = arith.constant 0 : index
    %0 = memref.load %arg1[%c0] : memref<10xf32, #tpu.memory_space<smem>>
    %c1 = arith.constant 1 : index
    %1 = memref.load %arg1[%c1] : memref<10xf32, #tpu.memory_space<smem>>
    %c2 = arith.constant 2 : index
    %2 = memref.load %arg1[%c2] : memref<10xf32, #tpu.memory_space<smem>>
    %c3 = arith.constant 3 : index
    %3 = memref.load %arg1[%c3] : memref<10xf32, #tpu.memory_space<smem>>
    %c4 = arith.constant 4 : index
    %4 = memref.load %arg1[%c4] : memref<10xf32, #tpu.memory_space<smem>>
    %c5 = arith.constant 5 : index
    %5 = memref.load %arg1[%c5] : memref<10xf32, #tpu.memory_space<smem>>
    %c6 = arith.constant 6 : index
    %6 = memref.load %arg1[%c6] : memref<10xf32, #tpu.memory_space<smem>>
    %c7 = arith.constant 7 : index
    %7 = memref.load %arg1[%c7] : memref<10xf32, #tpu.memory_space<smem>>
    %c8 = arith.constant 8 : index
    %8 = memref.load %arg1[%c8] : memref<10xf32, #tpu.memory_space<smem>>
    %c9 = arith.constant 9 : index
    %9 = memref.load %arg1[%c9] : memref<10xf32, #tpu.memory_space<smem>>
    %c0_0 = arith.constant 0 : index
    %10 = memref.load %arg2[%c0_0] : memref<10xf32, #tpu.memory_space<smem>>
    %c1_1 = arith.constant 1 : index
    %11 = memref.load %arg2[%c1_1] : memref<10xf32, #tpu.memory_space<smem>>
    %c2_2 = arith.constant 2 : index
    %12 = memref.load %arg2[%c2_2] : memref<10xf32, #tpu.memory_space<smem>>
    %c3_3 = arith.constant 3 : index
    %13 = memref.load %arg2[%c3_3] : memref<10xf32, #tpu.memory_space<smem>>
    %c4_4 = arith.constant 4 : index
    %14 = memref.load %arg2[%c4_4] : memref<10xf32, #tpu.memory_space<smem>>
    %c5_5 = arith.constant 5 : index
    %15 = memref.load %arg2[%c5_5] : memref<10xf32, #tpu.memory_space<smem>>
    %c6_6 = arith.constant 6 : index
    %16 = memref.load %arg2[%c6_6] : memref<10xf32, #tpu.memory_space<smem>>
    %c7_7 = arith.constant 7 : index
    %17 = memref.load %arg2[%c7_7] : memref<10xf32, #tpu.memory_space<smem>>
    %c8_8 = arith.constant 8 : index
    %18 = memref.load %arg2[%c8_8] : memref<10xf32, #tpu.memory_space<smem>>
    %c9_9 = arith.constant 9 : index
    %19 = memref.load %arg2[%c9_9] : memref<10xf32, #tpu.memory_space<smem>>
    %c0_10 = arith.constant 0 : index
    %c0_11 = arith.constant 0 : index
    %20 = memref.load %arg3[%c0_10, %c0_11] : memref<10x10xf32, #tpu.memory_space<smem>>
    %c0_12 = arith.constant 0 : index
    %c1_13 = arith.constant 1 : index
    %21 = memref.load %arg3[%c0_12, %c1_13] : memref<10x10xf32, #tpu.memory_space<smem>>
    %c0_14 = arith.constant 0 : index
    %c2_15 = arith.constant 2 : index
    %22 = memref.load %arg3[%c0_14, %c2_15] : memref<10x10xf32, #tpu.memory_space<smem>>
    %c0_16 = arith.constant 0 : index
    %c3_17 = arith.constant 3 : index
    %23 = memref.load %arg3[%c0_16, %c3_17] : memref<10x10xf32, #tpu.memory_space<smem>>
    %c0_18 = arith.constant 0 : index
    %c4_19 = arith.constant 4 : index
    %24 = memref.load %arg3[%c0_18, %c4_19] : memref<10x10xf32, #tpu.memory_space<smem>>
    %c0_20 = arith.constant 0 : index
    %c5_21 = arith.constant 5 : index
    %25 = memref.load %arg3[%c0_20, %c5_21] : memref<10x10xf32, #tpu.memory_space<smem>>
    %c0_22 = arith.constant 0 : index
    %c6_23 = arith.constant 6 : index
    %26 = memref.load %arg3[%c0_22, %c6_23] : memref<10x10xf32, #tpu.memory_space<smem>>
    %c0_24 = arith.constant 0 : index
    %c7_25 = arith.constant 7 : index
    %27 = memref.load %arg3[%c0_24, %c7_25] : memref<10x10xf32, #tpu.memory_space<smem>>
    %c0_26 = arith.constant 0 : index
    %c8_27 = arith.constant 8 : index
    %28 = memref.load %arg3[%c0_26, %c8_27] : memref<10x10xf32, #tpu.memory_space<smem>>
    %c0_28 = arith.constant 0 : index
    %c9_29 = arith.constant 9 : index
    %29 = memref.load %arg3[%c0_28, %c9_29] : memref<10x10xf32, #tpu.memory_space<smem>>
    %c1_30 = arith.constant 1 : index
    %c0_31 = arith.constant 0 : index
    %30 = memref.load %arg3[%c1_30, %c0_31] : memref<10x10xf32, #tpu.memory_space<smem>>
    %c1_32 = arith.constant 1 : index
    %c1_33 = arith.constant 1 : index
    %31 = memref.load %arg3[%c1_32, %c1_33] : memref<10x10xf32, #tpu.memory_space<smem>>
    %c1_34 = arith.constant 1 : index
    %c2_35 = arith.constant 2 : index
    %32 = memref.load %arg3[%c1_34, %c2_35] : memref<10x10xf32, #tpu.memory_space<smem>>
    %c1_36 = arith.constant 1 : index
    %c3_37 = arith.constant 3 : index
    %33 = memref.load %arg3[%c1_36, %c3_37] : memref<10x10xf32, #tpu.memory_space<smem>>
    %c1_38 = arith.constant 1 : index
    %c4_39 = arith.constant 4 : index
    %34 = memref.load %arg3[%c1_38, %c4_39] : memref<10x10xf32, #tpu.memory_space<smem>>
    %c1_40 = arith.constant 1 : index
    %c5_41 = arith.constant 5 : index
    %35 = memref.load %arg3[%c1_40, %c5_41] : memref<10x10xf32, #tpu.memory_space<smem>>
    %c1_42 = arith.constant 1 : index
    %c6_43 = arith.constant 6 : index
    %36 = memref.load %arg3[%c1_42, %c6_43] : memref<10x10xf32, #tpu.memory_space<smem>>
    %c1_44 = arith.constant 1 : index
    %c7_45 = arith.constant 7 : index
    %37 = memref.load %arg3[%c1_44, %c7_45] : memref<10x10xf32, #tpu.memory_space<smem>>
    %c1_46 = arith.constant 1 : index
    %c8_47 = arith.constant 8 : index
    %38 = memref.load %arg3[%c1_46, %c8_47] : memref<10x10xf32, #tpu.memory_space<smem>>
    %c1_48 = arith.constant 1 : index
    %c9_49 = arith.constant 9 : index
    %39 = memref.load %arg3[%c1_48, %c9_49] : memref<10x10xf32, #tpu.memory_space<smem>>
    %c2_50 = arith.constant 2 : index
    %c0_51 = arith.constant 0 : index
    %40 = memref.load %arg3[%c2_50, %c0_51] : memref<10x10xf32, #tpu.memory_space<smem>>
    %c2_52 = arith.constant 2 : index
    %c1_53 = arith.constant 1 : index
    %41 = memref.load %arg3[%c2_52, %c1_53] : memref<10x10xf32, #tpu.memory_space<smem>>
    %c2_54 = arith.constant 2 : index
    %c2_55 = arith.constant 2 : index
    %42 = memref.load %arg3[%c2_54, %c2_55] : memref<10x10xf32, #tpu.memory_space<smem>>
    %c2_56 = arith.constant 2 : index
    %c3_57 = arith.constant 3 : index
    %43 = memref.load %arg3[%c2_56, %c3_57] : memref<10x10xf32, #tpu.memory_space<smem>>
    %c2_58 = arith.constant 2 : index
    %c4_59 = arith.constant 4 : index
    %44 = memref.load %arg3[%c2_58, %c4_59] : memref<10x10xf32, #tpu.memory_space<smem>>
    %c2_60 = arith.constant 2 : index
    %c5_61 = arith.constant 5 : index
    %45 = memref.load %arg3[%c2_60, %c5_61] : memref<10x10xf32, #tpu.memory_space<smem>>
    %c2_62 = arith.constant 2 : index
    %c6_63 = arith.constant 6 : index
    %46 = memref.load %arg3[%c2_62, %c6_63] : memref<10x10xf32, #tpu.memory_space<smem>>
    %c2_64 = arith.constant 2 : index
    %c7_65 = arith.constant 7 : index
    %47 = memref.load %arg3[%c2_64, %c7_65] : memref<10x10xf32, #tpu.memory_space<smem>>
    %c2_66 = arith.constant 2 : index
    %c8_67 = arith.constant 8 : index
    %48 = memref.load %arg3[%c2_66, %c8_67] : memref<10x10xf32, #tpu.memory_space<smem>>
    %c2_68 = arith.constant 2 : index
    %c9_69 = arith.constant 9 : index
    %49 = memref.load %arg3[%c2_68, %c9_69] : memref<10x10xf32, #tpu.memory_space<smem>>
    %c3_70 = arith.constant 3 : index
    %c0_71 = arith.constant 0 : index
    %50 = memref.load %arg3[%c3_70, %c0_71] : memref<10x10xf32, #tpu.memory_space<smem>>
    %c3_72 = arith.constant 3 : index
    %c1_73 = arith.constant 1 : index
    %51 = memref.load %arg3[%c3_72, %c1_73] : memref<10x10xf32, #tpu.memory_space<smem>>
    %c3_74 = arith.constant 3 : index
    %c2_75 = arith.constant 2 : index
    %52 = memref.load %arg3[%c3_74, %c2_75] : memref<10x10xf32, #tpu.memory_space<smem>>
    %c3_76 = arith.constant 3 : index
    %c3_77 = arith.constant 3 : index
    %53 = memref.load %arg3[%c3_76, %c3_77] : memref<10x10xf32, #tpu.memory_space<smem>>
    %c3_78 = arith.constant 3 : index
    %c4_79 = arith.constant 4 : index
    %54 = memref.load %arg3[%c3_78, %c4_79] : memref<10x10xf32, #tpu.memory_space<smem>>
    %c3_80 = arith.constant 3 : index
    %c5_81 = arith.constant 5 : index
    %55 = memref.load %arg3[%c3_80, %c5_81] : memref<10x10xf32, #tpu.memory_space<smem>>
    %c3_82 = arith.constant 3 : index
    %c6_83 = arith.constant 6 : index
    %56 = memref.load %arg3[%c3_82, %c6_83] : memref<10x10xf32, #tpu.memory_space<smem>>
    %c3_84 = arith.constant 3 : index
    %c7_85 = arith.constant 7 : index
    %57 = memref.load %arg3[%c3_84, %c7_85] : memref<10x10xf32, #tpu.memory_space<smem>>
    %c3_86 = arith.constant 3 : index
    %c8_87 = arith.constant 8 : index
    %58 = memref.load %arg3[%c3_86, %c8_87] : memref<10x10xf32, #tpu.memory_space<smem>>
    %c3_88 = arith.constant 3 : index
    %c9_89 = arith.constant 9 : index
    %59 = memref.load %arg3[%c3_88, %c9_89] : memref<10x10xf32, #tpu.memory_space<smem>>
    %c4_90 = arith.constant 4 : index
    %c0_91 = arith.constant 0 : index
    %60 = memref.load %arg3[%c4_90, %c0_91] : memref<10x10xf32, #tpu.memory_space<smem>>
    %c4_92 = arith.constant 4 : index
    %c1_93 = arith.constant 1 : index
    %61 = memref.load %arg3[%c4_92, %c1_93] : memref<10x10xf32, #tpu.memory_space<smem>>
    %c4_94 = arith.constant 4 : index
    %c2_95 = arith.constant 2 : index
    %62 = memref.load %arg3[%c4_94, %c2_95] : memref<10x10xf32, #tpu.memory_space<smem>>
    %c4_96 = arith.constant 4 : index
    %c3_97 = arith.constant 3 : index
    %63 = memref.load %arg3[%c4_96, %c3_97] : memref<10x10xf32, #tpu.memory_space<smem>>
    %c4_98 = arith.constant 4 : index
    %c4_99 = arith.constant 4 : index
    %64 = memref.load %arg3[%c4_98, %c4_99] : memref<10x10xf32, #tpu.memory_space<smem>>
    %c4_100 = arith.constant 4 : index
    %c5_101 = arith.constant 5 : index
    %65 = memref.load %arg3[%c4_100, %c5_101] : memref<10x10xf32, #tpu.memory_space<smem>>
    %c4_102 = arith.constant 4 : index
    %c6_103 = arith.constant 6 : index
    %66 = memref.load %arg3[%c4_102, %c6_103] : memref<10x10xf32, #tpu.memory_space<smem>>
    %c4_104 = arith.constant 4 : index
    %c7_105 = arith.constant 7 : index
    %67 = memref.load %arg3[%c4_104, %c7_105] : memref<10x10xf32, #tpu.memory_space<smem>>
    %c4_106 = arith.constant 4 : index
    %c8_107 = arith.constant 8 : index
    %68 = memref.load %arg3[%c4_106, %c8_107] : memref<10x10xf32, #tpu.memory_space<smem>>
    %c4_108 = arith.constant 4 : index
    %c9_109 = arith.constant 9 : index
    %69 = memref.load %arg3[%c4_108, %c9_109] : memref<10x10xf32, #tpu.memory_space<smem>>
    %c5_110 = arith.constant 5 : index
    %c0_111 = arith.constant 0 : index
    %70 = memref.load %arg3[%c5_110, %c0_111] : memref<10x10xf32, #tpu.memory_space<smem>>
    %c5_112 = arith.constant 5 : index
    %c1_113 = arith.constant 1 : index
    %71 = memref.load %arg3[%c5_112, %c1_113] : memref<10x10xf32, #tpu.memory_space<smem>>
    %c5_114 = arith.constant 5 : index
    %c2_115 = arith.constant 2 : index
    %72 = memref.load %arg3[%c5_114, %c2_115] : memref<10x10xf32, #tpu.memory_space<smem>>
    %c5_116 = arith.constant 5 : index
    %c3_117 = arith.constant 3 : index
    %73 = memref.load %arg3[%c5_116, %c3_117] : memref<10x10xf32, #tpu.memory_space<smem>>
    %c5_118 = arith.constant 5 : index
    %c4_119 = arith.constant 4 : index
    %74 = memref.load %arg3[%c5_118, %c4_119] : memref<10x10xf32, #tpu.memory_space<smem>>
    %c5_120 = arith.constant 5 : index
    %c5_121 = arith.constant 5 : index
    %75 = memref.load %arg3[%c5_120, %c5_121] : memref<10x10xf32, #tpu.memory_space<smem>>
    %c5_122 = arith.constant 5 : index
    %c6_123 = arith.constant 6 : index
    %76 = memref.load %arg3[%c5_122, %c6_123] : memref<10x10xf32, #tpu.memory_space<smem>>
    %c5_124 = arith.constant 5 : index
    %c7_125 = arith.constant 7 : index
    %77 = memref.load %arg3[%c5_124, %c7_125] : memref<10x10xf32, #tpu.memory_space<smem>>
    %c5_126 = arith.constant 5 : index
    %c8_127 = arith.constant 8 : index
    %78 = memref.load %arg3[%c5_126, %c8_127] : memref<10x10xf32, #tpu.memory_space<smem>>
    %c5_128 = arith.constant 5 : index
    %c9_129 = arith.constant 9 : index
    %79 = memref.load %arg3[%c5_128, %c9_129] : memref<10x10xf32, #tpu.memory_space<smem>>
    %c6_130 = arith.constant 6 : index
    %c0_131 = arith.constant 0 : index
    %80 = memref.load %arg3[%c6_130, %c0_131] : memref<10x10xf32, #tpu.memory_space<smem>>
    %c6_132 = arith.constant 6 : index
    %c1_133 = arith.constant 1 : index
    %81 = memref.load %arg3[%c6_132, %c1_133] : memref<10x10xf32, #tpu.memory_space<smem>>
    %c6_134 = arith.constant 6 : index
    %c2_135 = arith.constant 2 : index
    %82 = memref.load %arg3[%c6_134, %c2_135] : memref<10x10xf32, #tpu.memory_space<smem>>
    %c6_136 = arith.constant 6 : index
    %c3_137 = arith.constant 3 : index
    %83 = memref.load %arg3[%c6_136, %c3_137] : memref<10x10xf32, #tpu.memory_space<smem>>
    %c6_138 = arith.constant 6 : index
    %c4_139 = arith.constant 4 : index
    %84 = memref.load %arg3[%c6_138, %c4_139] : memref<10x10xf32, #tpu.memory_space<smem>>
    %c6_140 = arith.constant 6 : index
    %c5_141 = arith.constant 5 : index
    %85 = memref.load %arg3[%c6_140, %c5_141] : memref<10x10xf32, #tpu.memory_space<smem>>
    %c6_142 = arith.constant 6 : index
    %c6_143 = arith.constant 6 : index
    %86 = memref.load %arg3[%c6_142, %c6_143] : memref<10x10xf32, #tpu.memory_space<smem>>
    %c6_144 = arith.constant 6 : index
    %c7_145 = arith.constant 7 : index
    %87 = memref.load %arg3[%c6_144, %c7_145] : memref<10x10xf32, #tpu.memory_space<smem>>
    %c6_146 = arith.constant 6 : index
    %c8_147 = arith.constant 8 : index
    %88 = memref.load %arg3[%c6_146, %c8_147] : memref<10x10xf32, #tpu.memory_space<smem>>
    %c6_148 = arith.constant 6 : index
    %c9_149 = arith.constant 9 : index
    %89 = memref.load %arg3[%c6_148, %c9_149] : memref<10x10xf32, #tpu.memory_space<smem>>
    %c7_150 = arith.constant 7 : index
    %c0_151 = arith.constant 0 : index
    %90 = memref.load %arg3[%c7_150, %c0_151] : memref<10x10xf32, #tpu.memory_space<smem>>
    %c7_152 = arith.constant 7 : index
    %c1_153 = arith.constant 1 : index
    %91 = memref.load %arg3[%c7_152, %c1_153] : memref<10x10xf32, #tpu.memory_space<smem>>
    %c7_154 = arith.constant 7 : index
    %c2_155 = arith.constant 2 : index
    %92 = memref.load %arg3[%c7_154, %c2_155] : memref<10x10xf32, #tpu.memory_space<smem>>
    %c7_156 = arith.constant 7 : index
    %c3_157 = arith.constant 3 : index
    %93 = memref.load %arg3[%c7_156, %c3_157] : memref<10x10xf32, #tpu.memory_space<smem>>
    %c7_158 = arith.constant 7 : index
    %c4_159 = arith.constant 4 : index
    %94 = memref.load %arg3[%c7_158, %c4_159] : memref<10x10xf32, #tpu.memory_space<smem>>
    %c7_160 = arith.constant 7 : index
    %c5_161 = arith.constant 5 : index
    %95 = memref.load %arg3[%c7_160, %c5_161] : memref<10x10xf32, #tpu.memory_space<smem>>
    %c7_162 = arith.constant 7 : index
    %c6_163 = arith.constant 6 : index
    %96 = memref.load %arg3[%c7_162, %c6_163] : memref<10x10xf32, #tpu.memory_space<smem>>
    %c7_164 = arith.constant 7 : index
    %c7_165 = arith.constant 7 : index
    %97 = memref.load %arg3[%c7_164, %c7_165] : memref<10x10xf32, #tpu.memory_space<smem>>
    %c7_166 = arith.constant 7 : index
    %c8_167 = arith.constant 8 : index
    %98 = memref.load %arg3[%c7_166, %c8_167] : memref<10x10xf32, #tpu.memory_space<smem>>
    %c7_168 = arith.constant 7 : index
    %c9_169 = arith.constant 9 : index
    %99 = memref.load %arg3[%c7_168, %c9_169] : memref<10x10xf32, #tpu.memory_space<smem>>
    %c8_170 = arith.constant 8 : index
    %c0_171 = arith.constant 0 : index
    %100 = memref.load %arg3[%c8_170, %c0_171] : memref<10x10xf32, #tpu.memory_space<smem>>
    %c8_172 = arith.constant 8 : index
    %c1_173 = arith.constant 1 : index
    %101 = memref.load %arg3[%c8_172, %c1_173] : memref<10x10xf32, #tpu.memory_space<smem>>
    %c8_174 = arith.constant 8 : index
    %c2_175 = arith.constant 2 : index
    %102 = memref.load %arg3[%c8_174, %c2_175] : memref<10x10xf32, #tpu.memory_space<smem>>
    %c8_176 = arith.constant 8 : index
    %c3_177 = arith.constant 3 : index
    %103 = memref.load %arg3[%c8_176, %c3_177] : memref<10x10xf32, #tpu.memory_space<smem>>
    %c8_178 = arith.constant 8 : index
    %c4_179 = arith.constant 4 : index
    %104 = memref.load %arg3[%c8_178, %c4_179] : memref<10x10xf32, #tpu.memory_space<smem>>
    %c8_180 = arith.constant 8 : index
    %c5_181 = arith.constant 5 : index
    %105 = memref.load %arg3[%c8_180, %c5_181] : memref<10x10xf32, #tpu.memory_space<smem>>
    %c8_182 = arith.constant 8 : index
    %c6_183 = arith.constant 6 : index
    %106 = memref.load %arg3[%c8_182, %c6_183] : memref<10x10xf32, #tpu.memory_space<smem>>
    %c8_184 = arith.constant 8 : index
    %c7_185 = arith.constant 7 : index
    %107 = memref.load %arg3[%c8_184, %c7_185] : memref<10x10xf32, #tpu.memory_space<smem>>
    %c8_186 = arith.constant 8 : index
    %c8_187 = arith.constant 8 : index
    %108 = memref.load %arg3[%c8_186, %c8_187] : memref<10x10xf32, #tpu.memory_space<smem>>
    %c8_188 = arith.constant 8 : index
    %c9_189 = arith.constant 9 : index
    %109 = memref.load %arg3[%c8_188, %c9_189] : memref<10x10xf32, #tpu.memory_space<smem>>
    %c9_190 = arith.constant 9 : index
    %c0_191 = arith.constant 0 : index
    %110 = memref.load %arg3[%c9_190, %c0_191] : memref<10x10xf32, #tpu.memory_space<smem>>
    %c9_192 = arith.constant 9 : index
    %c1_193 = arith.constant 1 : index
    %111 = memref.load %arg3[%c9_192, %c1_193] : memref<10x10xf32, #tpu.memory_space<smem>>
    %c9_194 = arith.constant 9 : index
    %c2_195 = arith.constant 2 : index
    %112 = memref.load %arg3[%c9_194, %c2_195] : memref<10x10xf32, #tpu.memory_space<smem>>
    %c9_196 = arith.constant 9 : index
    %c3_197 = arith.constant 3 : index
    %113 = memref.load %arg3[%c9_196, %c3_197] : memref<10x10xf32, #tpu.memory_space<smem>>
    %c9_198 = arith.constant 9 : index
    %c4_199 = arith.constant 4 : index
    %114 = memref.load %arg3[%c9_198, %c4_199] : memref<10x10xf32, #tpu.memory_space<smem>>
    %c9_200 = arith.constant 9 : index
    %c5_201 = arith.constant 5 : index
    %115 = memref.load %arg3[%c9_200, %c5_201] : memref<10x10xf32, #tpu.memory_space<smem>>
    %c9_202 = arith.constant 9 : index
    %c6_203 = arith.constant 6 : index
    %116 = memref.load %arg3[%c9_202, %c6_203] : memref<10x10xf32, #tpu.memory_space<smem>>
    %c9_204 = arith.constant 9 : index
    %c7_205 = arith.constant 7 : index
    %117 = memref.load %arg3[%c9_204, %c7_205] : memref<10x10xf32, #tpu.memory_space<smem>>
    %c9_206 = arith.constant 9 : index
    %c8_207 = arith.constant 8 : index
    %118 = memref.load %arg3[%c9_206, %c8_207] : memref<10x10xf32, #tpu.memory_space<smem>>
    %c9_208 = arith.constant 9 : index
    %c9_209 = arith.constant 9 : index
    %119 = memref.load %arg3[%c9_208, %c9_209] : memref<10x10xf32, #tpu.memory_space<smem>>
    %c0_210 = arith.constant 0 : index
    %120 = memref.load %arg4[%c0_210] : memref<10xf32, #tpu.memory_space<smem>>
    %c1_211 = arith.constant 1 : index
    %121 = memref.load %arg4[%c1_211] : memref<10xf32, #tpu.memory_space<smem>>
    %c2_212 = arith.constant 2 : index
    %122 = memref.load %arg4[%c2_212] : memref<10xf32, #tpu.memory_space<smem>>
    %c3_213 = arith.constant 3 : index
    %123 = memref.load %arg4[%c3_213] : memref<10xf32, #tpu.memory_space<smem>>
    %c4_214 = arith.constant 4 : index
    %124 = memref.load %arg4[%c4_214] : memref<10xf32, #tpu.memory_space<smem>>
    %c5_215 = arith.constant 5 : index
    %125 = memref.load %arg4[%c5_215] : memref<10xf32, #tpu.memory_space<smem>>
    %c6_216 = arith.constant 6 : index
    %126 = memref.load %arg4[%c6_216] : memref<10xf32, #tpu.memory_space<smem>>
    %c7_217 = arith.constant 7 : index
    %127 = memref.load %arg4[%c7_217] : memref<10xf32, #tpu.memory_space<smem>>
    %c8_218 = arith.constant 8 : index
    %128 = memref.load %arg4[%c8_218] : memref<10xf32, #tpu.memory_space<smem>>
    %c9_219 = arith.constant 9 : index
    %129 = memref.load %arg4[%c9_219] : memref<10xf32, #tpu.memory_space<smem>>
    %c0_220 = arith.constant 0 : index
    %130 = memref.load %arg5[%c0_220] : memref<10xf32, #tpu.memory_space<smem>>
    %c1_221 = arith.constant 1 : index
    %131 = memref.load %arg5[%c1_221] : memref<10xf32, #tpu.memory_space<smem>>
    %c2_222 = arith.constant 2 : index
    %132 = memref.load %arg5[%c2_222] : memref<10xf32, #tpu.memory_space<smem>>
    %c3_223 = arith.constant 3 : index
    %133 = memref.load %arg5[%c3_223] : memref<10xf32, #tpu.memory_space<smem>>
    %c4_224 = arith.constant 4 : index
    %134 = memref.load %arg5[%c4_224] : memref<10xf32, #tpu.memory_space<smem>>
    %c5_225 = arith.constant 5 : index
    %135 = memref.load %arg5[%c5_225] : memref<10xf32, #tpu.memory_space<smem>>
    %c6_226 = arith.constant 6 : index
    %136 = memref.load %arg5[%c6_226] : memref<10xf32, #tpu.memory_space<smem>>
    %c7_227 = arith.constant 7 : index
    %137 = memref.load %arg5[%c7_227] : memref<10xf32, #tpu.memory_space<smem>>
    %c8_228 = arith.constant 8 : index
    %138 = memref.load %arg5[%c8_228] : memref<10xf32, #tpu.memory_space<smem>>
    %c9_229 = arith.constant 9 : index
    %139 = memref.load %arg5[%c9_229] : memref<10xf32, #tpu.memory_space<smem>>
    %c0_230 = arith.constant 0 : index
    %140 = memref.load %arg6[%c0_230] : memref<1xf32, #tpu.memory_space<smem>>
    %141 = vector.broadcast %140 : f32 to vector<8x128xf32>
    %c0_i32 = arith.constant 0 : i32
    %c2_i32 = arith.constant 2 : i32
    %142 = arith.addi %c0_i32, %c2_i32 : i32
    %c1_i32 = arith.constant 1 : i32
    scf.for %arg9 = %c0_i32 to %142 step %c1_i32  : i32 {
      %c8_i32 = arith.constant 8 : i32
      %143 = arith.muli %arg9, %c8_i32 : i32
      %144 = tpu.assume_multiple %143, 8 : i32
      %145 = arith.index_cast %144 : i32 to index
      %c0_232 = arith.constant 0 : index
      %146 = vector.load %arg7[%145, %c0_232] : memref<16x128xf32, #tpu.memory_space<vmem>>, vector<8x128xf32>
      %147 = vector.broadcast %0 : f32 to vector<8x128xf32>
      %148 = arith.mulf %146, %147 : vector<8x128xf32>
      %149 = vector.broadcast %10 : f32 to vector<8x128xf32>
      %150 = arith.addf %148, %149 : vector<8x128xf32>
      %cst = arith.constant 0.000000e+00 : f32
      %151 = vector.broadcast %cst : f32 to vector<8x128xf32>
      %152 = arith.maximumf %150, %151 : vector<8x128xf32>
      %153 = vector.broadcast %1 : f32 to vector<8x128xf32>
      %154 = arith.mulf %146, %153 : vector<8x128xf32>
      %155 = vector.broadcast %11 : f32 to vector<8x128xf32>
      %156 = arith.addf %154, %155 : vector<8x128xf32>
      %cst_233 = arith.constant 0.000000e+00 : f32
      %157 = vector.broadcast %cst_233 : f32 to vector<8x128xf32>
      %158 = arith.maximumf %156, %157 : vector<8x128xf32>
      %159 = vector.broadcast %2 : f32 to vector<8x128xf32>
      %160 = arith.mulf %146, %159 : vector<8x128xf32>
      %161 = vector.broadcast %12 : f32 to vector<8x128xf32>
      %162 = arith.addf %160, %161 : vector<8x128xf32>
      %cst_234 = arith.constant 0.000000e+00 : f32
      %163 = vector.broadcast %cst_234 : f32 to vector<8x128xf32>
      %164 = arith.maximumf %162, %163 : vector<8x128xf32>
      %165 = vector.broadcast %3 : f32 to vector<8x128xf32>
      %166 = arith.mulf %146, %165 : vector<8x128xf32>
      %167 = vector.broadcast %13 : f32 to vector<8x128xf32>
      %168 = arith.addf %166, %167 : vector<8x128xf32>
      %cst_235 = arith.constant 0.000000e+00 : f32
      %169 = vector.broadcast %cst_235 : f32 to vector<8x128xf32>
      %170 = arith.maximumf %168, %169 : vector<8x128xf32>
      %171 = vector.broadcast %4 : f32 to vector<8x128xf32>
      %172 = arith.mulf %146, %171 : vector<8x128xf32>
      %173 = vector.broadcast %14 : f32 to vector<8x128xf32>
      %174 = arith.addf %172, %173 : vector<8x128xf32>
      %cst_236 = arith.constant 0.000000e+00 : f32
      %175 = vector.broadcast %cst_236 : f32 to vector<8x128xf32>
      %176 = arith.maximumf %174, %175 : vector<8x128xf32>
      %177 = vector.broadcast %5 : f32 to vector<8x128xf32>
      %178 = arith.mulf %146, %177 : vector<8x128xf32>
      %179 = vector.broadcast %15 : f32 to vector<8x128xf32>
      %180 = arith.addf %178, %179 : vector<8x128xf32>
      %cst_237 = arith.constant 0.000000e+00 : f32
      %181 = vector.broadcast %cst_237 : f32 to vector<8x128xf32>
      %182 = arith.maximumf %180, %181 : vector<8x128xf32>
      %183 = vector.broadcast %6 : f32 to vector<8x128xf32>
      %184 = arith.mulf %146, %183 : vector<8x128xf32>
      %185 = vector.broadcast %16 : f32 to vector<8x128xf32>
      %186 = arith.addf %184, %185 : vector<8x128xf32>
      %cst_238 = arith.constant 0.000000e+00 : f32
      %187 = vector.broadcast %cst_238 : f32 to vector<8x128xf32>
      %188 = arith.maximumf %186, %187 : vector<8x128xf32>
      %189 = vector.broadcast %7 : f32 to vector<8x128xf32>
      %190 = arith.mulf %146, %189 : vector<8x128xf32>
      %191 = vector.broadcast %17 : f32 to vector<8x128xf32>
      %192 = arith.addf %190, %191 : vector<8x128xf32>
      %cst_239 = arith.constant 0.000000e+00 : f32
      %193 = vector.broadcast %cst_239 : f32 to vector<8x128xf32>
      %194 = arith.maximumf %192, %193 : vector<8x128xf32>
      %195 = vector.broadcast %8 : f32 to vector<8x128xf32>
      %196 = arith.mulf %146, %195 : vector<8x128xf32>
      %197 = vector.broadcast %18 : f32 to vector<8x128xf32>
      %198 = arith.addf %196, %197 : vector<8x128xf32>
      %cst_240 = arith.constant 0.000000e+00 : f32
      %199 = vector.broadcast %cst_240 : f32 to vector<8x128xf32>
      %200 = arith.maximumf %198, %199 : vector<8x128xf32>
      %201 = vector.broadcast %9 : f32 to vector<8x128xf32>
      %202 = arith.mulf %146, %201 : vector<8x128xf32>
      %203 = vector.broadcast %19 : f32 to vector<8x128xf32>
      %204 = arith.addf %202, %203 : vector<8x128xf32>
      %cst_241 = arith.constant 0.000000e+00 : f32
      %205 = vector.broadcast %cst_241 : f32 to vector<8x128xf32>
      %206 = arith.maximumf %204, %205 : vector<8x128xf32>
      %207 = vector.broadcast %20 : f32 to vector<8x128xf32>
      %208 = arith.mulf %152, %207 : vector<8x128xf32>
      %209 = vector.broadcast %30 : f32 to vector<8x128xf32>
      %210 = arith.mulf %158, %209 : vector<8x128xf32>
      %211 = vector.broadcast %40 : f32 to vector<8x128xf32>
      %212 = arith.mulf %164, %211 : vector<8x128xf32>
      %213 = vector.broadcast %50 : f32 to vector<8x128xf32>
      %214 = arith.mulf %170, %213 : vector<8x128xf32>
      %215 = vector.broadcast %60 : f32 to vector<8x128xf32>
      %216 = arith.mulf %176, %215 : vector<8x128xf32>
      %217 = vector.broadcast %70 : f32 to vector<8x128xf32>
      %218 = arith.mulf %182, %217 : vector<8x128xf32>
      %219 = vector.broadcast %80 : f32 to vector<8x128xf32>
      %220 = arith.mulf %188, %219 : vector<8x128xf32>
      %221 = vector.broadcast %90 : f32 to vector<8x128xf32>
      %222 = arith.mulf %194, %221 : vector<8x128xf32>
      %223 = vector.broadcast %100 : f32 to vector<8x128xf32>
      %224 = arith.mulf %200, %223 : vector<8x128xf32>
      %225 = vector.broadcast %110 : f32 to vector<8x128xf32>
      %226 = arith.mulf %206, %225 : vector<8x128xf32>
      %227 = arith.addf %208, %210 : vector<8x128xf32>
      %228 = arith.addf %212, %214 : vector<8x128xf32>
      %229 = arith.addf %216, %218 : vector<8x128xf32>
      %230 = arith.addf %220, %222 : vector<8x128xf32>
      %231 = arith.addf %224, %226 : vector<8x128xf32>
      %232 = arith.addf %227, %228 : vector<8x128xf32>
      %233 = arith.addf %229, %230 : vector<8x128xf32>
      %234 = arith.addf %232, %233 : vector<8x128xf32>
      %235 = arith.addf %234, %231 : vector<8x128xf32>
      %236 = vector.broadcast %120 : f32 to vector<8x128xf32>
      %237 = arith.addf %235, %236 : vector<8x128xf32>
      %cst_242 = arith.constant 0.000000e+00 : f32
      %238 = vector.broadcast %cst_242 : f32 to vector<8x128xf32>
      %239 = arith.maximumf %237, %238 : vector<8x128xf32>
      %240 = vector.broadcast %130 : f32 to vector<8x128xf32>
      %241 = arith.mulf %239, %240 : vector<8x128xf32>
      %242 = arith.addf %141, %241 : vector<8x128xf32>
      %243 = vector.broadcast %21 : f32 to vector<8x128xf32>
      %244 = arith.mulf %152, %243 : vector<8x128xf32>
      %245 = vector.broadcast %31 : f32 to vector<8x128xf32>
      %246 = arith.mulf %158, %245 : vector<8x128xf32>
      %247 = vector.broadcast %41 : f32 to vector<8x128xf32>
      %248 = arith.mulf %164, %247 : vector<8x128xf32>
      %249 = vector.broadcast %51 : f32 to vector<8x128xf32>
      %250 = arith.mulf %170, %249 : vector<8x128xf32>
      %251 = vector.broadcast %61 : f32 to vector<8x128xf32>
      %252 = arith.mulf %176, %251 : vector<8x128xf32>
      %253 = vector.broadcast %71 : f32 to vector<8x128xf32>
      %254 = arith.mulf %182, %253 : vector<8x128xf32>
      %255 = vector.broadcast %81 : f32 to vector<8x128xf32>
      %256 = arith.mulf %188, %255 : vector<8x128xf32>
      %257 = vector.broadcast %91 : f32 to vector<8x128xf32>
      %258 = arith.mulf %194, %257 : vector<8x128xf32>
      %259 = vector.broadcast %101 : f32 to vector<8x128xf32>
      %260 = arith.mulf %200, %259 : vector<8x128xf32>
      %261 = vector.broadcast %111 : f32 to vector<8x128xf32>
      %262 = arith.mulf %206, %261 : vector<8x128xf32>
      %263 = arith.addf %244, %246 : vector<8x128xf32>
      %264 = arith.addf %248, %250 : vector<8x128xf32>
      %265 = arith.addf %252, %254 : vector<8x128xf32>
      %266 = arith.addf %256, %258 : vector<8x128xf32>
      %267 = arith.addf %260, %262 : vector<8x128xf32>
      %268 = arith.addf %263, %264 : vector<8x128xf32>
      %269 = arith.addf %265, %266 : vector<8x128xf32>
      %270 = arith.addf %268, %269 : vector<8x128xf32>
      %271 = arith.addf %270, %267 : vector<8x128xf32>
      %272 = vector.broadcast %121 : f32 to vector<8x128xf32>
      %273 = arith.addf %271, %272 : vector<8x128xf32>
      %cst_243 = arith.constant 0.000000e+00 : f32
      %274 = vector.broadcast %cst_243 : f32 to vector<8x128xf32>
      %275 = arith.maximumf %273, %274 : vector<8x128xf32>
      %276 = vector.broadcast %131 : f32 to vector<8x128xf32>
      %277 = arith.mulf %275, %276 : vector<8x128xf32>
      %278 = arith.addf %242, %277 : vector<8x128xf32>
      %279 = vector.broadcast %22 : f32 to vector<8x128xf32>
      %280 = arith.mulf %152, %279 : vector<8x128xf32>
      %281 = vector.broadcast %32 : f32 to vector<8x128xf32>
      %282 = arith.mulf %158, %281 : vector<8x128xf32>
      %283 = vector.broadcast %42 : f32 to vector<8x128xf32>
      %284 = arith.mulf %164, %283 : vector<8x128xf32>
      %285 = vector.broadcast %52 : f32 to vector<8x128xf32>
      %286 = arith.mulf %170, %285 : vector<8x128xf32>
      %287 = vector.broadcast %62 : f32 to vector<8x128xf32>
      %288 = arith.mulf %176, %287 : vector<8x128xf32>
      %289 = vector.broadcast %72 : f32 to vector<8x128xf32>
      %290 = arith.mulf %182, %289 : vector<8x128xf32>
      %291 = vector.broadcast %82 : f32 to vector<8x128xf32>
      %292 = arith.mulf %188, %291 : vector<8x128xf32>
      %293 = vector.broadcast %92 : f32 to vector<8x128xf32>
      %294 = arith.mulf %194, %293 : vector<8x128xf32>
      %295 = vector.broadcast %102 : f32 to vector<8x128xf32>
      %296 = arith.mulf %200, %295 : vector<8x128xf32>
      %297 = vector.broadcast %112 : f32 to vector<8x128xf32>
      %298 = arith.mulf %206, %297 : vector<8x128xf32>
      %299 = arith.addf %280, %282 : vector<8x128xf32>
      %300 = arith.addf %284, %286 : vector<8x128xf32>
      %301 = arith.addf %288, %290 : vector<8x128xf32>
      %302 = arith.addf %292, %294 : vector<8x128xf32>
      %303 = arith.addf %296, %298 : vector<8x128xf32>
      %304 = arith.addf %299, %300 : vector<8x128xf32>
      %305 = arith.addf %301, %302 : vector<8x128xf32>
      %306 = arith.addf %304, %305 : vector<8x128xf32>
      %307 = arith.addf %306, %303 : vector<8x128xf32>
      %308 = vector.broadcast %122 : f32 to vector<8x128xf32>
      %309 = arith.addf %307, %308 : vector<8x128xf32>
      %cst_244 = arith.constant 0.000000e+00 : f32
      %310 = vector.broadcast %cst_244 : f32 to vector<8x128xf32>
      %311 = arith.maximumf %309, %310 : vector<8x128xf32>
      %312 = vector.broadcast %132 : f32 to vector<8x128xf32>
      %313 = arith.mulf %311, %312 : vector<8x128xf32>
      %314 = arith.addf %278, %313 : vector<8x128xf32>
      %315 = vector.broadcast %23 : f32 to vector<8x128xf32>
      %316 = arith.mulf %152, %315 : vector<8x128xf32>
      %317 = vector.broadcast %33 : f32 to vector<8x128xf32>
      %318 = arith.mulf %158, %317 : vector<8x128xf32>
      %319 = vector.broadcast %43 : f32 to vector<8x128xf32>
      %320 = arith.mulf %164, %319 : vector<8x128xf32>
      %321 = vector.broadcast %53 : f32 to vector<8x128xf32>
      %322 = arith.mulf %170, %321 : vector<8x128xf32>
      %323 = vector.broadcast %63 : f32 to vector<8x128xf32>
      %324 = arith.mulf %176, %323 : vector<8x128xf32>
      %325 = vector.broadcast %73 : f32 to vector<8x128xf32>
      %326 = arith.mulf %182, %325 : vector<8x128xf32>
      %327 = vector.broadcast %83 : f32 to vector<8x128xf32>
      %328 = arith.mulf %188, %327 : vector<8x128xf32>
      %329 = vector.broadcast %93 : f32 to vector<8x128xf32>
      %330 = arith.mulf %194, %329 : vector<8x128xf32>
      %331 = vector.broadcast %103 : f32 to vector<8x128xf32>
      %332 = arith.mulf %200, %331 : vector<8x128xf32>
      %333 = vector.broadcast %113 : f32 to vector<8x128xf32>
      %334 = arith.mulf %206, %333 : vector<8x128xf32>
      %335 = arith.addf %316, %318 : vector<8x128xf32>
      %336 = arith.addf %320, %322 : vector<8x128xf32>
      %337 = arith.addf %324, %326 : vector<8x128xf32>
      %338 = arith.addf %328, %330 : vector<8x128xf32>
      %339 = arith.addf %332, %334 : vector<8x128xf32>
      %340 = arith.addf %335, %336 : vector<8x128xf32>
      %341 = arith.addf %337, %338 : vector<8x128xf32>
      %342 = arith.addf %340, %341 : vector<8x128xf32>
      %343 = arith.addf %342, %339 : vector<8x128xf32>
      %344 = vector.broadcast %123 : f32 to vector<8x128xf32>
      %345 = arith.addf %343, %344 : vector<8x128xf32>
      %cst_245 = arith.constant 0.000000e+00 : f32
      %346 = vector.broadcast %cst_245 : f32 to vector<8x128xf32>
      %347 = arith.maximumf %345, %346 : vector<8x128xf32>
      %348 = vector.broadcast %133 : f32 to vector<8x128xf32>
      %349 = arith.mulf %347, %348 : vector<8x128xf32>
      %350 = arith.addf %314, %349 : vector<8x128xf32>
      %351 = vector.broadcast %24 : f32 to vector<8x128xf32>
      %352 = arith.mulf %152, %351 : vector<8x128xf32>
      %353 = vector.broadcast %34 : f32 to vector<8x128xf32>
      %354 = arith.mulf %158, %353 : vector<8x128xf32>
      %355 = vector.broadcast %44 : f32 to vector<8x128xf32>
      %356 = arith.mulf %164, %355 : vector<8x128xf32>
      %357 = vector.broadcast %54 : f32 to vector<8x128xf32>
      %358 = arith.mulf %170, %357 : vector<8x128xf32>
      %359 = vector.broadcast %64 : f32 to vector<8x128xf32>
      %360 = arith.mulf %176, %359 : vector<8x128xf32>
      %361 = vector.broadcast %74 : f32 to vector<8x128xf32>
      %362 = arith.mulf %182, %361 : vector<8x128xf32>
      %363 = vector.broadcast %84 : f32 to vector<8x128xf32>
      %364 = arith.mulf %188, %363 : vector<8x128xf32>
      %365 = vector.broadcast %94 : f32 to vector<8x128xf32>
      %366 = arith.mulf %194, %365 : vector<8x128xf32>
      %367 = vector.broadcast %104 : f32 to vector<8x128xf32>
      %368 = arith.mulf %200, %367 : vector<8x128xf32>
      %369 = vector.broadcast %114 : f32 to vector<8x128xf32>
      %370 = arith.mulf %206, %369 : vector<8x128xf32>
      %371 = arith.addf %352, %354 : vector<8x128xf32>
      %372 = arith.addf %356, %358 : vector<8x128xf32>
      %373 = arith.addf %360, %362 : vector<8x128xf32>
      %374 = arith.addf %364, %366 : vector<8x128xf32>
      %375 = arith.addf %368, %370 : vector<8x128xf32>
      %376 = arith.addf %371, %372 : vector<8x128xf32>
      %377 = arith.addf %373, %374 : vector<8x128xf32>
      %378 = arith.addf %376, %377 : vector<8x128xf32>
      %379 = arith.addf %378, %375 : vector<8x128xf32>
      %380 = vector.broadcast %124 : f32 to vector<8x128xf32>
      %381 = arith.addf %379, %380 : vector<8x128xf32>
      %cst_246 = arith.constant 0.000000e+00 : f32
      %382 = vector.broadcast %cst_246 : f32 to vector<8x128xf32>
      %383 = arith.maximumf %381, %382 : vector<8x128xf32>
      %384 = vector.broadcast %134 : f32 to vector<8x128xf32>
      %385 = arith.mulf %383, %384 : vector<8x128xf32>
      %386 = arith.addf %350, %385 : vector<8x128xf32>
      %387 = vector.broadcast %25 : f32 to vector<8x128xf32>
      %388 = arith.mulf %152, %387 : vector<8x128xf32>
      %389 = vector.broadcast %35 : f32 to vector<8x128xf32>
      %390 = arith.mulf %158, %389 : vector<8x128xf32>
      %391 = vector.broadcast %45 : f32 to vector<8x128xf32>
      %392 = arith.mulf %164, %391 : vector<8x128xf32>
      %393 = vector.broadcast %55 : f32 to vector<8x128xf32>
      %394 = arith.mulf %170, %393 : vector<8x128xf32>
      %395 = vector.broadcast %65 : f32 to vector<8x128xf32>
      %396 = arith.mulf %176, %395 : vector<8x128xf32>
      %397 = vector.broadcast %75 : f32 to vector<8x128xf32>
      %398 = arith.mulf %182, %397 : vector<8x128xf32>
      %399 = vector.broadcast %85 : f32 to vector<8x128xf32>
      %400 = arith.mulf %188, %399 : vector<8x128xf32>
      %401 = vector.broadcast %95 : f32 to vector<8x128xf32>
      %402 = arith.mulf %194, %401 : vector<8x128xf32>
      %403 = vector.broadcast %105 : f32 to vector<8x128xf32>
      %404 = arith.mulf %200, %403 : vector<8x128xf32>
      %405 = vector.broadcast %115 : f32 to vector<8x128xf32>
      %406 = arith.mulf %206, %405 : vector<8x128xf32>
      %407 = arith.addf %388, %390 : vector<8x128xf32>
      %408 = arith.addf %392, %394 : vector<8x128xf32>
      %409 = arith.addf %396, %398 : vector<8x128xf32>
      %410 = arith.addf %400, %402 : vector<8x128xf32>
      %411 = arith.addf %404, %406 : vector<8x128xf32>
      %412 = arith.addf %407, %408 : vector<8x128xf32>
      %413 = arith.addf %409, %410 : vector<8x128xf32>
      %414 = arith.addf %412, %413 : vector<8x128xf32>
      %415 = arith.addf %414, %411 : vector<8x128xf32>
      %416 = vector.broadcast %125 : f32 to vector<8x128xf32>
      %417 = arith.addf %415, %416 : vector<8x128xf32>
      %cst_247 = arith.constant 0.000000e+00 : f32
      %418 = vector.broadcast %cst_247 : f32 to vector<8x128xf32>
      %419 = arith.maximumf %417, %418 : vector<8x128xf32>
      %420 = vector.broadcast %135 : f32 to vector<8x128xf32>
      %421 = arith.mulf %419, %420 : vector<8x128xf32>
      %422 = arith.addf %386, %421 : vector<8x128xf32>
      %423 = vector.broadcast %26 : f32 to vector<8x128xf32>
      %424 = arith.mulf %152, %423 : vector<8x128xf32>
      %425 = vector.broadcast %36 : f32 to vector<8x128xf32>
      %426 = arith.mulf %158, %425 : vector<8x128xf32>
      %427 = vector.broadcast %46 : f32 to vector<8x128xf32>
      %428 = arith.mulf %164, %427 : vector<8x128xf32>
      %429 = vector.broadcast %56 : f32 to vector<8x128xf32>
      %430 = arith.mulf %170, %429 : vector<8x128xf32>
      %431 = vector.broadcast %66 : f32 to vector<8x128xf32>
      %432 = arith.mulf %176, %431 : vector<8x128xf32>
      %433 = vector.broadcast %76 : f32 to vector<8x128xf32>
      %434 = arith.mulf %182, %433 : vector<8x128xf32>
      %435 = vector.broadcast %86 : f32 to vector<8x128xf32>
      %436 = arith.mulf %188, %435 : vector<8x128xf32>
      %437 = vector.broadcast %96 : f32 to vector<8x128xf32>
      %438 = arith.mulf %194, %437 : vector<8x128xf32>
      %439 = vector.broadcast %106 : f32 to vector<8x128xf32>
      %440 = arith.mulf %200, %439 : vector<8x128xf32>
      %441 = vector.broadcast %116 : f32 to vector<8x128xf32>
      %442 = arith.mulf %206, %441 : vector<8x128xf32>
      %443 = arith.addf %424, %426 : vector<8x128xf32>
      %444 = arith.addf %428, %430 : vector<8x128xf32>
      %445 = arith.addf %432, %434 : vector<8x128xf32>
      %446 = arith.addf %436, %438 : vector<8x128xf32>
      %447 = arith.addf %440, %442 : vector<8x128xf32>
      %448 = arith.addf %443, %444 : vector<8x128xf32>
      %449 = arith.addf %445, %446 : vector<8x128xf32>
      %450 = arith.addf %448, %449 : vector<8x128xf32>
      %451 = arith.addf %450, %447 : vector<8x128xf32>
      %452 = vector.broadcast %126 : f32 to vector<8x128xf32>
      %453 = arith.addf %451, %452 : vector<8x128xf32>
      %cst_248 = arith.constant 0.000000e+00 : f32
      %454 = vector.broadcast %cst_248 : f32 to vector<8x128xf32>
      %455 = arith.maximumf %453, %454 : vector<8x128xf32>
      %456 = vector.broadcast %136 : f32 to vector<8x128xf32>
      %457 = arith.mulf %455, %456 : vector<8x128xf32>
      %458 = arith.addf %422, %457 : vector<8x128xf32>
      %459 = vector.broadcast %27 : f32 to vector<8x128xf32>
      %460 = arith.mulf %152, %459 : vector<8x128xf32>
      %461 = vector.broadcast %37 : f32 to vector<8x128xf32>
      %462 = arith.mulf %158, %461 : vector<8x128xf32>
      %463 = vector.broadcast %47 : f32 to vector<8x128xf32>
      %464 = arith.mulf %164, %463 : vector<8x128xf32>
      %465 = vector.broadcast %57 : f32 to vector<8x128xf32>
      %466 = arith.mulf %170, %465 : vector<8x128xf32>
      %467 = vector.broadcast %67 : f32 to vector<8x128xf32>
      %468 = arith.mulf %176, %467 : vector<8x128xf32>
      %469 = vector.broadcast %77 : f32 to vector<8x128xf32>
      %470 = arith.mulf %182, %469 : vector<8x128xf32>
      %471 = vector.broadcast %87 : f32 to vector<8x128xf32>
      %472 = arith.mulf %188, %471 : vector<8x128xf32>
      %473 = vector.broadcast %97 : f32 to vector<8x128xf32>
      %474 = arith.mulf %194, %473 : vector<8x128xf32>
      %475 = vector.broadcast %107 : f32 to vector<8x128xf32>
      %476 = arith.mulf %200, %475 : vector<8x128xf32>
      %477 = vector.broadcast %117 : f32 to vector<8x128xf32>
      %478 = arith.mulf %206, %477 : vector<8x128xf32>
      %479 = arith.addf %460, %462 : vector<8x128xf32>
      %480 = arith.addf %464, %466 : vector<8x128xf32>
      %481 = arith.addf %468, %470 : vector<8x128xf32>
      %482 = arith.addf %472, %474 : vector<8x128xf32>
      %483 = arith.addf %476, %478 : vector<8x128xf32>
      %484 = arith.addf %479, %480 : vector<8x128xf32>
      %485 = arith.addf %481, %482 : vector<8x128xf32>
      %486 = arith.addf %484, %485 : vector<8x128xf32>
      %487 = arith.addf %486, %483 : vector<8x128xf32>
      %488 = vector.broadcast %127 : f32 to vector<8x128xf32>
      %489 = arith.addf %487, %488 : vector<8x128xf32>
      %cst_249 = arith.constant 0.000000e+00 : f32
      %490 = vector.broadcast %cst_249 : f32 to vector<8x128xf32>
      %491 = arith.maximumf %489, %490 : vector<8x128xf32>
      %492 = vector.broadcast %137 : f32 to vector<8x128xf32>
      %493 = arith.mulf %491, %492 : vector<8x128xf32>
      %494 = arith.addf %458, %493 : vector<8x128xf32>
      %495 = vector.broadcast %28 : f32 to vector<8x128xf32>
      %496 = arith.mulf %152, %495 : vector<8x128xf32>
      %497 = vector.broadcast %38 : f32 to vector<8x128xf32>
      %498 = arith.mulf %158, %497 : vector<8x128xf32>
      %499 = vector.broadcast %48 : f32 to vector<8x128xf32>
      %500 = arith.mulf %164, %499 : vector<8x128xf32>
      %501 = vector.broadcast %58 : f32 to vector<8x128xf32>
      %502 = arith.mulf %170, %501 : vector<8x128xf32>
      %503 = vector.broadcast %68 : f32 to vector<8x128xf32>
      %504 = arith.mulf %176, %503 : vector<8x128xf32>
      %505 = vector.broadcast %78 : f32 to vector<8x128xf32>
      %506 = arith.mulf %182, %505 : vector<8x128xf32>
      %507 = vector.broadcast %88 : f32 to vector<8x128xf32>
      %508 = arith.mulf %188, %507 : vector<8x128xf32>
      %509 = vector.broadcast %98 : f32 to vector<8x128xf32>
      %510 = arith.mulf %194, %509 : vector<8x128xf32>
      %511 = vector.broadcast %108 : f32 to vector<8x128xf32>
      %512 = arith.mulf %200, %511 : vector<8x128xf32>
      %513 = vector.broadcast %118 : f32 to vector<8x128xf32>
      %514 = arith.mulf %206, %513 : vector<8x128xf32>
      %515 = arith.addf %496, %498 : vector<8x128xf32>
      %516 = arith.addf %500, %502 : vector<8x128xf32>
      %517 = arith.addf %504, %506 : vector<8x128xf32>
      %518 = arith.addf %508, %510 : vector<8x128xf32>
      %519 = arith.addf %512, %514 : vector<8x128xf32>
      %520 = arith.addf %515, %516 : vector<8x128xf32>
      %521 = arith.addf %517, %518 : vector<8x128xf32>
      %522 = arith.addf %520, %521 : vector<8x128xf32>
      %523 = arith.addf %522, %519 : vector<8x128xf32>
      %524 = vector.broadcast %128 : f32 to vector<8x128xf32>
      %525 = arith.addf %523, %524 : vector<8x128xf32>
      %cst_250 = arith.constant 0.000000e+00 : f32
      %526 = vector.broadcast %cst_250 : f32 to vector<8x128xf32>
      %527 = arith.maximumf %525, %526 : vector<8x128xf32>
      %528 = vector.broadcast %138 : f32 to vector<8x128xf32>
      %529 = arith.mulf %527, %528 : vector<8x128xf32>
      %530 = arith.addf %494, %529 : vector<8x128xf32>
      %531 = vector.broadcast %29 : f32 to vector<8x128xf32>
      %532 = arith.mulf %152, %531 : vector<8x128xf32>
      %533 = vector.broadcast %39 : f32 to vector<8x128xf32>
      %534 = arith.mulf %158, %533 : vector<8x128xf32>
      %535 = vector.broadcast %49 : f32 to vector<8x128xf32>
      %536 = arith.mulf %164, %535 : vector<8x128xf32>
      %537 = vector.broadcast %59 : f32 to vector<8x128xf32>
      %538 = arith.mulf %170, %537 : vector<8x128xf32>
      %539 = vector.broadcast %69 : f32 to vector<8x128xf32>
      %540 = arith.mulf %176, %539 : vector<8x128xf32>
      %541 = vector.broadcast %79 : f32 to vector<8x128xf32>
      %542 = arith.mulf %182, %541 : vector<8x128xf32>
      %543 = vector.broadcast %89 : f32 to vector<8x128xf32>
      %544 = arith.mulf %188, %543 : vector<8x128xf32>
      %545 = vector.broadcast %99 : f32 to vector<8x128xf32>
      %546 = arith.mulf %194, %545 : vector<8x128xf32>
      %547 = vector.broadcast %109 : f32 to vector<8x128xf32>
      %548 = arith.mulf %200, %547 : vector<8x128xf32>
      %549 = vector.broadcast %119 : f32 to vector<8x128xf32>
      %550 = arith.mulf %206, %549 : vector<8x128xf32>
      %551 = arith.addf %532, %534 : vector<8x128xf32>
      %552 = arith.addf %536, %538 : vector<8x128xf32>
      %553 = arith.addf %540, %542 : vector<8x128xf32>
      %554 = arith.addf %544, %546 : vector<8x128xf32>
      %555 = arith.addf %548, %550 : vector<8x128xf32>
      %556 = arith.addf %551, %552 : vector<8x128xf32>
      %557 = arith.addf %553, %554 : vector<8x128xf32>
      %558 = arith.addf %556, %557 : vector<8x128xf32>
      %559 = arith.addf %558, %555 : vector<8x128xf32>
      %560 = vector.broadcast %129 : f32 to vector<8x128xf32>
      %561 = arith.addf %559, %560 : vector<8x128xf32>
      %cst_251 = arith.constant 0.000000e+00 : f32
      %562 = vector.broadcast %cst_251 : f32 to vector<8x128xf32>
      %563 = arith.maximumf %561, %562 : vector<8x128xf32>
      %564 = vector.broadcast %139 : f32 to vector<8x128xf32>
      %565 = arith.mulf %563, %564 : vector<8x128xf32>
      %566 = arith.addf %530, %565 : vector<8x128xf32>
      %567 = arith.index_cast %144 : i32 to index
      %c0_252 = arith.constant 0 : index
      %568 = vector.load %arg8[%567, %c0_252] : memref<16x128xf32, #tpu.memory_space<vmem>>, vector<8x128xf32>
      tpu.vector_store %arg8[%567, %c0_252], %566 {strides = array<i32>} : memref<16x128xf32, #tpu.memory_space<vmem>>, vector<8x128xf32>,
    }
    %c2_i32_231 = arith.constant 2 : i32
    return
  }
  func.func @transform_0(%arg0: i32) -> i32 {
    %c0_i32 = arith.constant 0 : i32
    %c0_i32_0 = arith.constant 0 : i32
    return %c0_i32 : i32
  }
  func.func @transform_1(%arg0: i32) -> i32 {
    %c0_i32 = arith.constant 0 : i32
    %c0_i32_0 = arith.constant 0 : i32
    return %c0_i32 : i32
  }
  func.func @transform_2(%arg0: i32) -> (i32, i32) {
    %c0_i32 = arith.constant 0 : i32
    %c0_i32_0 = arith.constant 0 : i32
    %c0_i32_1 = arith.constant 0 : i32
    return %c0_i32, %c0_i32_0 : i32, i32
  }
  func.func @transform_3(%arg0: i32) -> i32 {
    %c0_i32 = arith.constant 0 : i32
    %c0_i32_0 = arith.constant 0 : i32
    return %c0_i32 : i32
  }
  func.func @transform_4(%arg0: i32) -> i32 {
    %c0_i32 = arith.constant 0 : i32
    %c0_i32_0 = arith.constant 0 : i32
    return %c0_i32 : i32
  }
  func.func @transform_5(%arg0: i32) -> i32 {
    %c0_i32 = arith.constant 0 : i32
    %c0_i32_0 = arith.constant 0 : i32
    return %c0_i32 : i32
  }
  func.func @transform_6(%arg0: i32) -> (i32, i32) {
    %c0_i32 = arith.constant 0 : i32
    %c0_i32_0 = arith.constant 0 : i32
    return %arg0, %c0_i32 : i32, i32
  }
  func.func @transform_7(%arg0: i32) -> (i32, i32) {
    %c0_i32 = arith.constant 0 : i32
    %c0_i32_0 = arith.constant 0 : i32
    return %arg0, %c0_i32 : i32, i32
  }
}

</mosaic_0001>

<bundles_post_ra>
// kernel: tpu_custom_call.1
= control target key start
LH: loop header
LB: loop body
LE: loop exit
PB: predicated region body
PF: predicated region fallthrough
CT: control target
= control target key end

     0   :  { %s2350_s0 = inlined_call_operand.vmem [shape: f32[10], index: 0, kind: input, shape index: {}]   ;;  %s2351_s1 = inlined_call_operand.vmem [shape: f32[10], index: 1, kind: input, shape index: {}]   ;;  %s2352_s2 = inlined_call_operand.hbm [shape: f32[10,10], index: 2, kind: input, shape index: {}]   ;;  %s2353_s3 = inlined_call_operand.vmem [shape: f32[10], index: 3, kind: input, shape index: {}]   ;;  %s2354_s4 = inlined_call_operand.vmem [shape: f32[10], index: 4, kind: input, shape index: {}]   ;;  %s2355_s5 = inlined_call_operand.<no memory space> [shape: f32[1], index: 5, kind: input, shape index: {}]   ;;  %s2356_s6 = inlined_call_operand.hbm [shape: f32[32,128], index: 6, kind: input, shape index: {}]   ;;  %s2357_s7 = inlined_call_operand.hbm [shape: f32[32,128], index: 7, kind: output, shape index: {}]  }
   0x1   :  { %2374 = sst [smem:[#allocation158_spill]] %s2350_s0 }
   0x2   :  { %2375 = sst [smem:[#allocation159_spill]] %s2351_s1 }
   0x3   :  { %2376 = sst [smem:[#allocation160_spill]] %s2352_s2 }
   0x4   :  { %2377 = sst [smem:[#allocation161_spill]] %s2353_s3 }
   0x5   :  { %2378 = sst [smem:[#allocation162_spill]] %s2354_s4 }
   0x6   :  { %2379 = sst [smem:[#allocation163_spill]] %s2356_s6 }
   0x7   :  { %2380 = sst [smem:[#allocation164_spill]] %s2357_s7 }
   0x8   :  { %12 = sst [smem:[#allocation2]] %s2355_s5 }
   0x9   :  { %13 = vsyncpa [#allocation7], 0 }
   0xa   :  { %14 = vsyncpa [#allocation9], 0 }
   0xb   :  { %15 = vsyncpa [#allocation6], 0 }
   0xc   :  { %16 = vsyncpa [#allocation13], 0 }
   0xd   :  { %17 = vsyncpa [#allocation4], 0 }
   0xe   :  { %19 = vsyncpa [#allocation4 + $0x1], 0 }
   0xf   :  { %20 = vsyncpa [#allocation5], 0 }
  0x10   :  { %22 = vsyncpa [#allocation5 + $0x1], 0  ;;  %s1597_s26 = smov 0   ;;  %s1599_s27 = smov 0  }
  0x11   :  { %s1601_s28 = smov 0   ;;  %s1603_s29 = smov 0  }
  0x12 LB: > { %2381 = sst [smem:[#allocation23_spill]] %s1527_s26  ;;  %s1621_s9 = sadd.s32 4294967295, %s1539_s29   ;;  %s1539_s29 = sphi %s1603_s29, %s2666_s29   ;;  %s1535_s28 = sphi %s1601_s28, %s2669_s28   ;;  %s1531_s27 = sphi %s1599_s27, %s2668_s27   ;;  %s1527_s26 = sphi %s1597_s26, %s2667_s26  }
  0x13   : > { %2382 = sst [smem:[#allocation24_spill]] %s1531_s27  ;;  %p1074_p0 = scmp.ge.s32.totalorder %s1539_s29, 1 }
  0x14   : > { %2383 = sst [smem:[#allocation25_spill]] %s1535_s28  ;;  %p175_p1 = scmp.eq.s32.totalorder %s1621_s9, 0 }
  0x15   : > { %2384 = sst [smem:[#allocation26_spill]] %s1539_s29  ;;  %p211_p2 = scmp.lt.s32.totalorder %s1539_s29, 3 }
  0x16   : > { %s2385_s1 = sld [smem:[#allocation159_spill]]  ;;  %s1545_s21 = smov [#allocation8]  }
  0x17   : > { %2386 = sst [smem:[#allocation27_spill]] %s1621_s9  ;;  %p1626_p3 = pnand %p1074_p0, %p211_p2 }
  0x18   : > { %s2388_s0 = sld [smem:[#allocation158_spill]]  ;;  %s1546_s22 = smov [#allocation3]  }
  0x19   : > { %p1259_p5 = pneg %p1626_p3  ;;  %s2389_s2 = sld [smem:[#allocation160_spill]] }
  0x1a   : > { %s2391_s3 = sld [smem:[#allocation161_spill]]  ;;  %s1547_s23 = smov [#allocation10]  }
  0x1b   : > { %p1641_p6 = pnand %p1259_p5, %p175_p1  ;;  %s2358_s24 = smov 128  }
  0x1c   : > { %s233_s8 = sshll.u32 %s2385_s1, 4  ;;  %s2359_s25 = smov 8   ;;  %s234_s8 = int_to_ptr.vmem [resolvable:$true] %s233_s8 }
  0x1d   : > { %1265 = dma.vmem_to_smem (!%p1641_p6), %s234_s8, 16, %s1545_s21, [#allocation9]  }
  0x1e   : > { %s223_s13 = sshll.u32 %s2388_s0, 4  ;;  %s1550_s5 = smov [#allocation11]   ;;  %s224_s13 = int_to_ptr.vmem [resolvable:$true] %s223_s13 }
  0x1f   : > { %s242_s16 = sshll.u32 %s2389_s2, 4  ;;  %s2392_s4 = sld [smem:[#allocation162_spill]]  ;;  %s243_s16 = int_to_ptr.hbm [resolvable:$true] %s242_s16 }
  0x20   : > { %s255_s20 = sshll.u32 %s2391_s3, 4  ;;  %s1551_s12 = smov [#allocation12]   ;;  %s256_s20 = int_to_ptr.vmem [resolvable:$true] %s255_s20 }
  0x21   : > { %1262 = dma.vmem_to_smem (!%p1641_p6), %s224_s13, 16, %s1546_s22, [#allocation7]  }
  0x22   : > { %1268 = dma.hbm_to_smem (!%p1641_p6), %s243_s16, 256, %s1547_s23, [#allocation6], %s2358_s24, %s2358_s24, %s2359_s25  }
  0x23   : > { %1271 = dma.vmem_to_smem (!%p1641_p6), %s256_s20, 16, %s1550_s5, [#allocation9]  }
  0x24   : > { %s1073_s13 = sadd.s32 4294967294, %s1539_s29   ;;  %s1666_s14 = sadd.s32 1, %s1539_s29  }
  0x25   : > { %s265_s11 = sshll.u32 %s2392_s4, 4  ;;  %2393 = sst [smem:[#allocation28_spill]] %s1666_s14  ;;  %s266_s11 = int_to_ptr.vmem [resolvable:$true] %s265_s11 }
  0x26   : > { %1274 = dma.vmem_to_smem (!%p1641_p6), %s266_s11, 16, %s1551_s12, [#allocation13]  }
  0x27   : > { %s161_s15 = sadd.s32 1, %s1535_s28  ;;  %s158_s16 = ssub.s32 %s1539_s29, %s1666_s14 }
  0x28   : > { %p168_p7 = scmp.ne.s32.totalorder %s1535_s28, %s1531_s27  ;;  %p159_p8 = scmp.eq.s32.totalorder %s158_s16, 0 }
  0x29   : > { %p169_p9 = scmp.eq.s32.totalorder %s1539_s29, 0  ;;  %p174_p10 = scmp.ne.s32.totalorder %s1531_s27, %s1527_s26 }
  0x2a   : > { %p198_p11 = scmp.eq.s32.totalorder %s1621_s9, 1  ;;  %p204_p0 = scmp.eq.s32.totalorder %s1073_s13, 1 }
  0x2b   : > { %s1678_s18 = scalar_select %p159_p8, %s1535_s28, %s161_s15  }
  0x2c   : > { %p1682_p12 = por %p175_p1, %p174_p10  ;;  %p1686_p13 = por %p198_p11, %p168_p7 }
  0x2d   : > { %2394 = sst [smem:[#allocation29_spill]] %s1678_s18  ;;  %p170_p2 = por %p169_p9, %p168_p7 }
  0x2e   : > { %s2396_s19 = scalar_select %p1686_p13, 1, 0 }
  0x2f   : > { %s279_s20 = sand.u32 1, %s1535_s28   ;;  %p1691_p5 = por %p204_p0, %p174_p10 }
  0x30   : > { %2397 = sst [smem:[#allocation30_spill]] %s2396_s19  ;;  %p1288_p6 = scmp.lt.s32.totalorder %s1539_s29, 2 }
  0x31   : > { %s2398_s21 = scalar_select %p1691_p5, 1, 0 }
  0x32   : > { %s1081_s22 = sshll.u32 %s279_s20, 4  ;;  %s1233_s23 = sshll.u32 %s1539_s29, 4 }
  0x33   : > { %2399 = sst [smem:[#allocation31_spill]] %s2398_s21  ;;  %s283_s12 = scalar_lea.vmem [#allocation14], %s1081_s22 }
  0x34   : > { %s2400_s6 = sld [smem:[#allocation163_spill]]  ;;  %s291_s15 = sshll.u32 %s283_s12, 4  ;;  %s292_s15 = int_to_ptr.vmem [resolvable:$true] %s291_s15 }
  0x35   : > { %p1700_p8 = pnand %p1288_p6, %p170_p2  ;;  %s280_s16 = scalar_lea.sflag [#allocation4], %s279_s20 }
  0x37   : > { %p1423_p9 = pneg %p1700_p8 }
  0x3a   : > { %s288_s8 = scalar_lea.hbm %s2400_s6, %s1233_s23  ;;  %s1426_s22 = scalar_lea.hbm %s2400_s6, 32 }
  0x3b   : > { %s289_s11 = sshll.u32 %s288_s8, 4  ;;  %s290_s11 = int_to_ptr.hbm [resolvable:$true] %s289_s11 }
  0x3c   : > { %s1419_s24 = sshra.s32 %s290_s11, 4  ;;  %s1420_s24 = int_to_ptr.hbm [resolvable:$true] %s1419_s24 }
  0x3d   : > { %s1421_s25 = scalar_lea.hbm %s1420_s24, 16  ;;  %p1427_p0 = scmp.lt.s32.totalorder %s1420_s24, %s2400_s6 }
  0x3e   : > { %p1422_p7 = scmp.ne.s32.totalorder %s1420_s24, %s1421_s25  ;;  %p1428_p2 = scmp.lt.s32.totalorder %s1426_s22, %s1421_s25 }
  0x40   : > { %p1424_p10 = pnand %p1423_p9, %p1422_p7  ;;  %p1429_p6 = por %p1428_p2, %p1427_p0 }
  0x42   : > { %p1425_p11 = pneg %p1424_p10 }
  0x44   : > { %p1430_p4 = pnand %p1429_p6, %p1425_p11 }
  0x46   : > { %1433 = shalt.err (!%p1430_p4)
}
  0x47   : > { %s2402_s20 = smov 8   ;;  %s2403_s12 = smov 128  }
  0x48   : > { %1278 = dma.hbm_to_vmem [thread:$0]  (!%p1700_p8), %s290_s11, 256, %s292_s15, %s280_s16, %s2403_s12, %s2403_s12, %s2402_s20  }
  0x49   : > { %303 = sbr.rel (%p1626_p3) target bundleno = 513 (0x201), region = 48 }
  0x4e   : > { %1498 = dma.done.wait (%p175_p1), [#allocation7], 16  }
  0x4f   : > { %1500 = vsyncadd (%p175_p1), [#allocation7], 4294967280 }
  0x50   : > { %1502 = dma.done.wait (%p175_p1), [#allocation9], 16  }
  0x51   : > { %1504 = vsyncadd (%p175_p1), [#allocation9], 4294967280 }
  0x52   : > { %1506 = dma.done.wait (%p175_p1), [#allocation6], 256  }
  0x53   : > { %1508 = vsyncadd (%p175_p1), [#allocation6], 4294967040 }
  0x54   : > { %1510 = dma.done.wait (%p175_p1), [#allocation9], 16  }
  0x55   : > { %1512 = vsyncadd (%p175_p1), [#allocation9], 4294967280 }
  0x56   : > { %1514 = dma.done.wait (%p175_p1), [#allocation13], 16  }
  0x57   : > { %1516 = vsyncadd (%p175_p1), [#allocation13], 4294967280  ;;  %s1740_s10 = sand.u32 1, %s1531_s27  }
  0x58   : > { %2404 = sst [smem:[#allocation32_spill]] %s1740_s10  ;;  %s2360_s24 = sshll.u32 %s1740_s10, 4 }
  0x59   : > { %s331_s25 = scalar_lea.sflag [#allocation4], %s1740_s10  ;;  %s1746_s11 = scalar_lea.vmem [#allocation14], %s2360_s24 }
  0x5a   : > { %1518 = dma.done.wait (%p1682_p12), %s331_s25, 256  }
  0x5b   : > { %1520 = vsyncadd (%p1682_p12), %s331_s25, 4294967040 }
  0x5c   : > { %340 = sfence }
  0x5d   : > { %s1752_s15 = sld [smem:[#allocation3]] }
  0x5e   : > { %s1754_s13 = sld [smem:[#allocation3 + $0x1]] }
  0x5f   : > { %s1756_s16 = sld [smem:[#allocation3 + $0x2]] }
  0x60   : > { %s1758_s23 = sld [smem:[#allocation3 + $0x3]] }
  0x61   : > { %s1760_s5 = sld [smem:[#allocation3 + $0x4]] }
  0x62   : > { %s1762_s22 = sld [smem:[#allocation3 + $0x5]] }
  0x63   : > { %s1764_s30 = sld [smem:[#allocation3 + $0x6]] }
  0x64   : > { %s1766_s8 = sld [smem:[#allocation3 + $0x7]] }
  0x65   : > { %s1768_s20 = sld [smem:[#allocation3 + $0x8]] }
  0x66   : > { %s1770_s17 = sld [smem:[#allocation3 + $0x9]] }
  0x67   : > { %2405 = sst [smem:[#allocation33_spill]] %s1760_s5 }
  0x68   : > { %s1772_s12 = sld [smem:[#allocation8]] }
  0x69   : > { %s1774_s25 = sld [smem:[#allocation8 + $0x1]] }
  0x6a   : > { %2406 = sst [smem:[#allocation34_spill]] %s1766_s8 }
  0x6b   : > { %s1776_s24 = sld [smem:[#allocation8 + $0x2]] }
  0x6c   : > { %2407 = sst [smem:[#allocation35_spill]] %s1770_s17 }
  0x6d   : > { %s1778_s0 = sld [smem:[#allocation8 + $0x3]] }
  0x6e   : > { %s1780_s1 = sld [smem:[#allocation8 + $0x4]] }
  0x6f   : > { %s1782_s2 = sld [smem:[#allocation8 + $0x5]] }
  0x70   : > { %s1784_s3 = sld [smem:[#allocation8 + $0x6]] }
  0x71   : > { %s1786_s4 = sld [smem:[#allocation8 + $0x7]] }
  0x72   : > { %s1788_s6 = sld [smem:[#allocation8 + $0x8]] }
  0x73   : > { %2408 = sst [smem:[#allocation36_spill]] %s1778_s0 }
  0x74   : > { %2409 = sst [smem:[#allocation37_spill]] %s1780_s1 }
  0x75   : > { %2410 = sst [smem:[#allocation38_spill]] %s1782_s2 }
  0x76   : > { %2411 = sst [smem:[#allocation39_spill]] %s1784_s3 }
  0x77   : > { %2412 = sst [smem:[#allocation40_spill]] %s1786_s4 }
  0x78   : > { %2413 = sst [smem:[#allocation41_spill]] %s1788_s6 }
  0x79   : > { %s1790_s18 = sld [smem:[#allocation8 + $0x9]] }
  0x7a   : > { %s1792_s28 = sld [smem:[#allocation10]] }
  0x7b   : > { %s1794_s27 = sld [smem:[#allocation10 + $0x1]] }
  0x7c   : > { %s1796_s14 = sld [smem:[#allocation10 + $0x2]] }
  0x7d   : > { %s1798_s29 = sld [smem:[#allocation10 + $0x3]] }
  0x7e   : > { %s1800_s21 = sld [smem:[#allocation10 + $0x4]] }
  0x7f   : > { %2414 = sst [smem:[#allocation42_spill]] %s1790_s18 }
  0x80   : > { %2415 = sst [smem:[#allocation43_spill]] %s1792_s28 }
  0x81   : > { %2416 = sst [smem:[#allocation44_spill]] %s1794_s27 }
  0x82   : > { %2417 = sst [smem:[#allocation45_spill]] %s1796_s14 }
  0x83   : > { %2418 = sst [smem:[#allocation46_spill]] %s1798_s29 }
  0x84   : > { %2419 = sst [smem:[#allocation47_spill]] %s1800_s21 }
  0x85   : > { %s1802_s26 = sld [smem:[#allocation10 + $0x5]] }
  0x86   : > { %s1804_s7 = sld [smem:[#allocation10 + $0x6]] }
  0x87   : > { %s1806_s19 = sld [smem:[#allocation10 + $0x7]] }
  0x88   : > { %s1808_s9 = sld [smem:[#allocation10 + $0x8]] }
  0x89   : > { %s1810_s17 = sld [smem:[#allocation10 + $0x9]] }
  0x8a   : > { %s1812_s18 = sld [smem:[#allocation10 + $0x80]] }
  0x8b   : > { %2420 = sst [smem:[#allocation48_spill]] %s1802_s26 }
  0x8c   : > { %2421 = sst [smem:[#allocation49_spill]] %s1804_s7 }
  0x8d   : > { %2422 = sst [smem:[#allocation50_spill]] %s1806_s19 }
  0x8e   : > { %2423 = sst [smem:[#allocation51_spill]] %s1808_s9 }
  0x8f   : > { %2424 = sst [smem:[#allocation52_spill]] %s1810_s17 }
  0x90   : > { %2425 = sst [smem:[#allocation53_spill]] %s1812_s18 }
  0x91   : > { %s1814_s28 = sld [smem:[#allocation10 + $0x81]] }
  0x92   : > { %s1816_s27 = sld [smem:[#allocation10 + $0x82]] }
  0x93   : > { %s1818_s14 = sld [smem:[#allocation10 + $0x83]] }
  0x94   : > { %s1820_s29 = sld [smem:[#allocation10 + $0x84]] }
  0x95   : > { %s1822_s21 = sld [smem:[#allocation10 + $0x85]] }
  0x96   : > { %s1824_s26 = sld [smem:[#allocation10 + $0x86]] }
  0x97   : > { %2426 = sst [smem:[#allocation54_spill]] %s1814_s28 }
  0x98   : > { %2427 = sst [smem:[#allocation55_spill]] %s1816_s27 }
  0x99   : > { %2428 = sst [smem:[#allocation56_spill]] %s1818_s14 }
  0x9a   : > { %2429 = sst [smem:[#allocation57_spill]] %s1820_s29 }
  0x9b   : > { %2430 = sst [smem:[#allocation58_spill]] %s1822_s21 }
  0x9c   : > { %2431 = sst [smem:[#allocation59_spill]] %s1824_s26 }
  0x9d   : > { %s1826_s7 = sld [smem:[#allocation10 + $0x87]] }
  0x9e   : > { %s1828_s19 = sld [smem:[#allocation10 + $0x88]] }
  0x9f   : > { %s1830_s9 = sld [smem:[#allocation10 + $0x89]] }
  0xa0   : > { %s1832_s17 = sld [smem:[#allocation10 + $0x100]] }
  0xa1   : > { %s1834_s18 = sld [smem:[#allocation10 + $0x101]] }
  0xa2   : > { %s1836_s28 = sld [smem:[#allocation10 + $0x102]] }
  0xa3   : > { %2432 = sst [smem:[#allocation60_spill]] %s1826_s7 }
  0xa4   : > { %2433 = sst [smem:[#allocation61_spill]] %s1828_s19 }
  0xa5   : > { %2434 = sst [smem:[#allocation62_spill]] %s1830_s9 }
  0xa6   : > { %2435 = sst [smem:[#allocation63_spill]] %s1832_s17 }
  0xa7   : > { %2436 = sst [smem:[#allocation64_spill]] %s1834_s18 }
  0xa8   : > { %2437 = sst [smem:[#allocation65_spill]] %s1836_s28 }
  0xa9   : > { %s1838_s27 = sld [smem:[#allocation10 + $0x103]] }
  0xaa   : > { %s1840_s14 = sld [smem:[#allocation10 + $0x104]] }
  0xab   : > { %s1842_s29 = sld [smem:[#allocation10 + $0x105]] }
  0xac   : > { %s1844_s21 = sld [smem:[#allocation10 + $0x106]] }
  0xad   : > { %s1846_s26 = sld [smem:[#allocation10 + $0x107]] }
  0xae   : > { %s1848_s7 = sld [smem:[#allocation10 + $0x108]] }
  0xaf   : > { %2438 = sst [smem:[#allocation66_spill]] %s1838_s27 }
  0xb0   : > { %2439 = sst [smem:[#allocation67_spill]] %s1840_s14 }
  0xb1   : > { %2440 = sst [smem:[#allocation68_spill]] %s1842_s29 }
  0xb2   : > { %2441 = sst [smem:[#allocation69_spill]] %s1844_s21 }
  0xb3   : > { %2442 = sst [smem:[#allocation70_spill]] %s1846_s26 }
  0xb4   : > { %2443 = sst [smem:[#allocation71_spill]] %s1848_s7 }
  0xb5   : > { %s1850_s19 = sld [smem:[#allocation10 + $0x109]] }
  0xb6   : > { %s1852_s9 = sld [smem:[#allocation10 + $0x180]] }
  0xb7   : > { %s1854_s17 = sld [smem:[#allocation10 + $0x181]] }
  0xb8   : > { %s1856_s18 = sld [smem:[#allocation10 + $0x182]] }
  0xb9   : > { %s1858_s28 = sld [smem:[#allocation10 + $0x183]] }
  0xba   : > { %s1860_s27 = sld [smem:[#allocation10 + $0x184]] }
  0xbb   : > { %2444 = sst [smem:[#allocation72_spill]] %s1850_s19 }
  0xbc   : > { %2445 = sst [smem:[#allocation73_spill]] %s1852_s9 }
  0xbd   : > { %2446 = sst [smem:[#allocation74_spill]] %s1854_s17 }
  0xbe   : > { %2447 = sst [smem:[#allocation75_spill]] %s1856_s18 }
  0xbf   : > { %2448 = sst [smem:[#allocation76_spill]] %s1858_s28 }
  0xc0   : > { %2449 = sst [smem:[#allocation77_spill]] %s1860_s27 }
  0xc1   : > { %s1862_s14 = sld [smem:[#allocation10 + $0x185]] }
  0xc2   : > { %s1864_s29 = sld [smem:[#allocation10 + $0x186]] }
  0xc3   : > { %s1866_s21 = sld [smem:[#allocation10 + $0x187]] }
  0xc4   : > { %s1868_s26 = sld [smem:[#allocation10 + $0x188]] }
  0xc5   : > { %s1870_s7 = sld [smem:[#allocation10 + $0x189]] }
  0xc6   : > { %s1872_s19 = sld [smem:[#allocation10 + $0x200]] }
  0xc7   : > { %2450 = sst [smem:[#allocation78_spill]] %s1862_s14 }
  0xc8   : > { %2451 = sst [smem:[#allocation79_spill]] %s1864_s29 }
  0xc9   : > { %2452 = sst [smem:[#allocation80_spill]] %s1866_s21 }
  0xca   : > { %2453 = sst [smem:[#allocation81_spill]] %s1868_s26 }
  0xcb   : > { %2454 = sst [smem:[#allocation82_spill]] %s1870_s7 }
  0xcc   : > { %2455 = sst [smem:[#allocation83_spill]] %s1872_s19 }
  0xcd   : > { %s1874_s9 = sld [smem:[#allocation10 + $0x201]] }
  0xce   : > { %s1876_s17 = sld [smem:[#allocation10 + $0x202]] }
  0xcf   : > { %s1878_s18 = sld [smem:[#allocation10 + $0x203]] }
  0xd0   : > { %s1880_s28 = sld [smem:[#allocation10 + $0x204]] }
  0xd1   : > { %s1882_s27 = sld [smem:[#allocation10 + $0x205]] }
  0xd2   : > { %s1884_s14 = sld [smem:[#allocation10 + $0x206]] }
  0xd3   : > { %2456 = sst [smem:[#allocation84_spill]] %s1874_s9 }
  0xd4   : > { %2457 = sst [smem:[#allocation85_spill]] %s1876_s17 }
  0xd5   : > { %2458 = sst [smem:[#allocation86_spill]] %s1878_s18 }
  0xd6   : > { %2459 = sst [smem:[#allocation87_spill]] %s1880_s28 }
  0xd7   : > { %2460 = sst [smem:[#allocation88_spill]] %s1882_s27 }
  0xd8   : > { %2461 = sst [smem:[#allocation89_spill]] %s1884_s14 }
  0xd9   : > { %s1886_s29 = sld [smem:[#allocation10 + $0x207]] }
  0xda   : > { %s1888_s21 = sld [smem:[#allocation10 + $0x208]] }
  0xdb   : > { %s1890_s26 = sld [smem:[#allocation10 + $0x209]] }
  0xdc   : > { %s1892_s7 = sld [smem:[#allocation10 + $0x280]] }
  0xdd   : > { %s1894_s19 = sld [smem:[#allocation10 + $0x281]] }
  0xde   : > { %s1896_s9 = sld [smem:[#allocation10 + $0x282]] }
  0xdf   : > { %2462 = sst [smem:[#allocation90_spill]] %s1886_s29 }
  0xe0   : > { %2463 = sst [smem:[#allocation91_spill]] %s1888_s21 }
  0xe1   : > { %2464 = sst [smem:[#allocation92_spill]] %s1890_s26 }
  0xe2   : > { %2465 = sst [smem:[#allocation93_spill]] %s1892_s7 }
  0xe3   : > { %2466 = sst [smem:[#allocation94_spill]] %s1894_s19 }
  0xe4   : > { %2467 = sst [smem:[#allocation95_spill]] %s1896_s9 }
  0xe5   : > { %s1898_s17 = sld [smem:[#allocation10 + $0x283]] }
  0xe6   : > { %s1900_s18 = sld [smem:[#allocation10 + $0x284]] }
  0xe7   : > { %s1902_s28 = sld [smem:[#allocation10 + $0x285]] }
  0xe8   : > { %s1904_s27 = sld [smem:[#allocation10 + $0x286]] }
  0xe9   : > { %s1906_s14 = sld [smem:[#allocation10 + $0x287]] }
  0xea   : > { %s1908_s29 = sld [smem:[#allocation10 + $0x288]] }
  0xeb   : > { %2468 = sst [smem:[#allocation96_spill]] %s1898_s17 }
  0xec   : > { %2469 = sst [smem:[#allocation97_spill]] %s1900_s18 }
  0xed   : > { %2470 = sst [smem:[#allocation98_spill]] %s1902_s28 }
  0xee   : > { %2471 = sst [smem:[#allocation99_spill]] %s1904_s27 }
  0xef   : > { %2472 = sst [smem:[#allocation100_spill]] %s1906_s14 }
  0xf0   : > { %2473 = sst [smem:[#allocation101_spill]] %s1908_s29 }
  0xf1   : > { %s1910_s21 = sld [smem:[#allocation10 + $0x289]] }
  0xf2   : > { %s1912_s26 = sld [smem:[#allocation10 + $0x300]] }
  0xf3   : > { %s1914_s7 = sld [smem:[#allocation10 + $0x301]] }
  0xf4   : > { %s1916_s19 = sld [smem:[#allocation10 + $0x302]] }
  0xf5   : > { %s1918_s9 = sld [smem:[#allocation10 + $0x303]] }
  0xf6   : > { %s1920_s17 = sld [smem:[#allocation10 + $0x304]] }
  0xf7   : > { %2474 = sst [smem:[#allocation102_spill]] %s1910_s21 }
  0xf8   : > { %2475 = sst [smem:[#allocation103_spill]] %s1912_s26 }
  0xf9   : > { %2476 = sst [smem:[#allocation104_spill]] %s1914_s7 }
  0xfa   : > { %2477 = sst [smem:[#allocation105_spill]] %s1916_s19 }
  0xfb   : > { %2478 = sst [smem:[#allocation106_spill]] %s1918_s9 }
  0xfc   : > { %2479 = sst [smem:[#allocation107_spill]] %s1920_s17 }
  0xfd   : > { %s1922_s18 = sld [smem:[#allocation10 + $0x305]] }
  0xfe   : > { %s1924_s28 = sld [smem:[#allocation10 + $0x306]] }
  0xff   : > { %s1926_s27 = sld [smem:[#allocation10 + $0x307]] }
 0x100   : > { %s1928_s14 = sld [smem:[#allocation10 + $0x308]] }
 0x101   : > { %s1930_s29 = sld [smem:[#allocation10 + $0x309]] }
 0x102   : > { %s1932_s21 = sld [smem:[#allocation10 + $0x380]] }
 0x103   : > { %2480 = sst [smem:[#allocation108_spill]] %s1922_s18 }
 0x104   : > { %2481 = sst [smem:[#allocation109_spill]] %s1924_s28 }
 0x105   : > { %2482 = sst [smem:[#allocation110_spill]] %s1926_s27 }
 0x106   : > { %2483 = sst [smem:[#allocation111_spill]] %s1928_s14 }
 0x107   : > { %2484 = sst [smem:[#allocation112_spill]] %s1930_s29 }
 0x108   : > { %2485 = sst [smem:[#allocation113_spill]] %s1932_s21 }
 0x109   : > { %s1934_s26 = sld [smem:[#allocation10 + $0x381]] }
 0x10a   : > { %s1936_s7 = sld [smem:[#allocation10 + $0x382]] }
 0x10b   : > { %s1938_s19 = sld [smem:[#allocation10 + $0x383]] }
 0x10c   : > { %s1940_s9 = sld [smem:[#allocation10 + $0x384]] }
 0x10d   : > { %s1942_s17 = sld [smem:[#allocation10 + $0x385]] }
 0x10e   : > { %s1944_s18 = sld [smem:[#allocation10 + $0x386]] }
 0x10f   : > { %2486 = sst [smem:[#allocation114_spill]] %s1934_s26 }
 0x110   : > { %2487 = sst [smem:[#allocation115_spill]] %s1936_s7 }
 0x111   : > { %2488 = sst [smem:[#allocation116_spill]] %s1938_s19 }
 0x112   : > { %2489 = sst [smem:[#allocation117_spill]] %s1940_s9 }
 0x113   : > { %2490 = sst [smem:[#allocation118_spill]] %s1942_s17 }
 0x114   : > { %2491 = sst [smem:[#allocation119_spill]] %s1944_s18 }
 0x115   : > { %s1946_s28 = sld [smem:[#allocation10 + $0x387]] }
 0x116   : > { %s1948_s27 = sld [smem:[#allocation10 + $0x388]] }
 0x117   : > { %s1950_s14 = sld [smem:[#allocation10 + $0x389]] }
 0x118   : > { %s1952_s29 = sld [smem:[#allocation10 + $0x400]] }
 0x119   : > { %s1954_s21 = sld [smem:[#allocation10 + $0x401]] }
 0x11a   : > { %s1956_s26 = sld [smem:[#allocation10 + $0x402]] }
 0x11b   : > { %2492 = sst [smem:[#allocation120_spill]] %s1946_s28 }
 0x11c   : > { %2493 = sst [smem:[#allocation121_spill]] %s1948_s27 }
 0x11d   : > { %2494 = sst [smem:[#allocation122_spill]] %s1950_s14 }
 0x11e   : > { %2495 = sst [smem:[#allocation123_spill]] %s1952_s29 }
 0x11f   : > { %2496 = sst [smem:[#allocation124_spill]] %s1954_s21 }
 0x120   : > { %2497 = sst [smem:[#allocation125_spill]] %s1956_s26 }
 0x121   : > { %s1958_s7 = sld [smem:[#allocation10 + $0x403]] }
 0x122   : > { %s1960_s19 = sld [smem:[#allocation10 + $0x404]] }
 0x123   : > { %s1962_s9 = sld [smem:[#allocation10 + $0x405]] }
 0x124   : > { %s1964_s17 = sld [smem:[#allocation10 + $0x406]] }
 0x125   : > { %s1966_s18 = sld [smem:[#allocation10 + $0x407]] }
 0x126   : > { %s1968_s28 = sld [smem:[#allocation10 + $0x408]] }
 0x127   : > { %2498 = sst [smem:[#allocation126_spill]] %s1958_s7 }
 0x128   : > { %2499 = sst [smem:[#allocation127_spill]] %s1960_s19 }
 0x129   : > { %2500 = sst [smem:[#allocation128_spill]] %s1962_s9 }
 0x12a   : > { %2501 = sst [smem:[#allocation129_spill]] %s1964_s17 }
 0x12b   : > { %2502 = sst [smem:[#allocation130_spill]] %s1966_s18 }
 0x12c   : > { %2503 = sst [smem:[#allocation131_spill]] %s1968_s28 }
 0x12d   : > { %s1970_s27 = sld [smem:[#allocation10 + $0x409]] }
 0x12e   : > { %s1972_s14 = sld [smem:[#allocation10 + $0x480]] }
 0x12f   : > { %s1974_s29 = sld [smem:[#allocation10 + $0x481]] }
 0x130   : > { %s1976_s21 = sld [smem:[#allocation10 + $0x482]] }
 0x131   : > { %s1978_s26 = sld [smem:[#allocation10 + $0x483]] }
 0x132   : > { %s1980_s7 = sld [smem:[#allocation10 + $0x484]] }
 0x133   : > { %2504 = sst [smem:[#allocation132_spill]] %s1970_s27 }
 0x134   : > { %2505 = sst [smem:[#allocation133_spill]] %s1972_s14 }
 0x135   : > { %2506 = sst [smem:[#allocation134_spill]] %s1974_s29 }
 0x136   : > { %2507 = sst [smem:[#allocation135_spill]] %s1976_s21 }
 0x137   : > { %2508 = sst [smem:[#allocation136_spill]] %s1978_s26 }
 0x138   : > { %2509 = sst [smem:[#allocation137_spill]] %s1980_s7 }
 0x139   : > { %s1982_s19 = sld [smem:[#allocation10 + $0x485]] }
 0x13a   : > { %s1984_s9 = sld [smem:[#allocation10 + $0x486]] }
 0x13b   : > { %s1986_s17 = sld [smem:[#allocation10 + $0x487]] }
 0x13c   : > { %s1988_s18 = sld [smem:[#allocation10 + $0x488]] }
 0x13d   : > { %s1990_s28 = sld [smem:[#allocation10 + $0x489]] }
 0x13e   : > { %s1992_s27 = sld [smem:[#allocation11]] }
 0x13f   : > { %2510 = sst [smem:[#allocation138_spill]] %s1982_s19 }
 0x140   : > { %2511 = sst [smem:[#allocation139_spill]] %s1984_s9 }
 0x141   : > { %2512 = sst [smem:[#allocation140_spill]] %s1986_s17 }
 0x142   : > { %2513 = sst [smem:[#allocation141_spill]] %s1988_s18 }
 0x143   : > { %2514 = sst [smem:[#allocation142_spill]] %s1990_s28 }
 0x144   : > { %2515 = sst [smem:[#allocation143_spill]] %s1992_s27 }
 0x145   : > { %s1994_s14 = sld [smem:[#allocation11 + $0x1]] }
 0x146   : > { %s1996_s29 = sld [smem:[#allocation11 + $0x2]] }
 0x147   : > { %s1998_s21 = sld [smem:[#allocation11 + $0x3]] }
 0x148   : > { %s2000_s26 = sld [smem:[#allocation11 + $0x4]] }
 0x149   : > { %s2002_s7 = sld [smem:[#allocation11 + $0x5]] }
 0x14a   : > { %s2004_s19 = sld [smem:[#allocation11 + $0x6]] }
 0x14b   : > { %2516 = sst [smem:[#allocation144_spill]] %s1994_s14 }
 0x14c   : > { %2517 = sst [smem:[#allocation145_spill]] %s1996_s29 }
 0x14d   : > { %2518 = sst [smem:[#allocation146_spill]] %s1998_s21 }
 0x14e   : > { %2519 = sst [smem:[#allocation147_spill]] %s2000_s26 }
 0x14f   : > { %2520 = sst [smem:[#allocation148_spill]] %s2002_s7 }
 0x150   : > { %2521 = sst [smem:[#allocation149_spill]] %s2004_s19 }
 0x151   : > { %s2006_s17 = sld [smem:[#allocation11 + $0x7]] }
 0x152   : > { %s2008_s18 = sld [smem:[#allocation11 + $0x8]] }
 0x153   : > { %s2010_s28 = sld [smem:[#allocation11 + $0x9]] }
 0x154   : > { %s2012_s9 = sld [smem:[#allocation12]] }
 0x155   : > { %s2014_s14 = sld [smem:[#allocation12 + $0x1]] }
 0x156   : > { %s2016_s29 = sld [smem:[#allocation12 + $0x2]] }
 0x157   : > { %2522 = sst [smem:[#allocation150_spill]] %s2006_s17 }
 0x158   : > { %2523 = sst [smem:[#allocation151_spill]] %s2008_s18 }
 0x159   : > { %2524 = sst [smem:[#allocation152_spill]] %s2010_s28 }
 0x15a   : > { %2525 = sst [smem:[#allocation153_spill]] %s2012_s9 }
 0x15b   : > { %2526 = sst [smem:[#allocation154_spill]] %s2014_s14  ;;  %s2529_s14 = sshll.u32 %s1740_s10, 4 }
 0x15c   : > { %2527 = sst [smem:[#allocation155_spill]] %s2016_s29  ;;  %s2037_s29 = scalar_lea.vmem [#allocation15], %s2529_s14 }
 0x15d   : > { %s2018_s21 = sld [smem:[#allocation12 + $0x3]] }
 0x15e   : > { %s2020_s26 = sld [smem:[#allocation12 + $0x4]] }
 0x15f   : > { %s2022_s7 = sld [smem:[#allocation12 + $0x5]] }
 0x160   : > { %s2024_s19 = sld [smem:[#allocation12 + $0x6]] }
 0x161   : > { %s2026_s27 = sld [smem:[#allocation12 + $0x7]] }
 0x162   : > { %s2028_s17 = sld [smem:[#allocation12 + $0x8]] }
 0x163   : > { %2528 = sst [smem:[#allocation156_spill]] %s2018_s21  ;;  %s2039_s21 = smov 0  }
 0x164   : > { %s2030_s18 = sld [smem:[#allocation12 + $0x9]] }
 0x165   : > { %s2032_s28 = sld [smem:[#allocation2]] }
 0x166   : > { %2530 = sst [smem:[#allocation157_spill]] %s2037_s29 }
 0x16b   : > { %v510_v0 = vstv %s2032_s28 }
 0x16c LB: >> { %s2531_s0 = sld [smem:[#allocation36_spill]]  ;;  %v520_v1 = vstv %s1752_s15  ;;  %v522_v2 = vstv %s1772_s12  ;;  %v525_v3 = vstv %s1754_s13  ;;  %v527_v4 = vstv %s1774_s25  ;;  %s2373_s10 = sshll.u32 %s1543_s21, 3  ;;  %s1543_s21 = sphi %s2039_s21, %s516_s21  }
 0x16d   : >> { %s2532_s5 = sld [smem:[#allocation33_spill]]  ;;  %v530_v5 = vstv %s1756_s16  ;;  %v532_v6 = vstv %s1776_s24  ;;  %v535_v7 = vstv %s1758_s23  ;;  %v545_v11 = vstv %s1762_s22  ;;  %s518_s29 = scalar_lea.vmem %s1746_s11, %s2373_s10 [#allocation14] }
 0x16e   : >> { %s2533_s1 = sld [smem:[#allocation37_spill]]  ;;  %v550_v13 = vstv %s1764_s30  ;;  %v519_v17 = vld [vmem:[%s518_s29] sm:$0xff]  ;;  %v560_v18 = vstv %s1768_s20 }
 0x16f   : >> { %s2534_s2 = sld [smem:[#allocation38_spill]]  ;;  %v521_v21 = vmul.f32 %v520_v1, %v519_v17  ;;  %v526_v22 = vmul.f32 %v525_v3, %v519_v17  ;;  %v531_v23 = vmul.f32 %v530_v5, %v519_v17  ;;  %v536_v24 = vmul.f32 %v535_v7, %v519_v17 }
 0x170   : >> { %s2535_s3 = sld [smem:[#allocation39_spill]]  ;;  %v546_v26 = vmul.f32 %v545_v11, %v519_v17  ;;  %v551_v27 = vmul.f32 %v550_v13, %v519_v17  ;;  %v561_v45 = vmul.f32 %v560_v18, %v519_v17 }
 0x171   : >> { %s2536_s8 = sld [smem:[#allocation34_spill]]  ;;  %v523_v29 = vadd.f32 %v522_v2, %v521_v21  ;;  %v528_v30 = vadd.f32 %v527_v4, %v526_v22  ;;  %v533_v31 = vadd.f32 %v532_v6, %v531_v23 }
 0x172   : >> { %s2537_s4 = sld [smem:[#allocation40_spill]]  ;;  %v537_v8 = vstv %s2531_s0 }
 0x173   : >> { %s2538_s6 = sld [smem:[#allocation41_spill]]  ;;  %v540_v9 = vstv %s2532_s5  ;;  %v538_v32 = vadd.f32 %v537_v8, %v536_v24  ;;  %v2067_v37 = vmax.f32 %v523_v29, 0.0  ;;  %v2069_v38 = vmax.f32 %v528_v30, 0.0 }
 0x174   : >> { %s2539_s14 = sld [smem:[#allocation35_spill]]  ;;  %v542_v10 = vstv %s2533_s1  ;;  %v541_v25 = vmul.f32 %v540_v9, %v519_v17  ;;  %v2071_v39 = vmax.f32 %v533_v31, 0.0 }
 0x175   : >> { %v547_v12 = vstv %s2534_s2  ;;  %s2540_s10 = sld [smem:[#allocation42_spill]]  ;;  %v2073_v40 = vmax.f32 %v538_v32, 0.0 }
 0x176   : >> { %v552_v14 = vstv %s2535_s3  ;;  %s2541_s0 = sld [smem:[#allocation43_spill]]  ;;  %v543_v33 = vadd.f32 %v542_v10, %v541_v25  ;;  %v548_v34 = vadd.f32 %v547_v12, %v546_v26 }
 0x177   : >> { %v555_v15 = vstv %s2536_s8  ;;  %s2542_s29 = sld [smem:[#allocation53_spill]]  ;;  %v553_v35 = vadd.f32 %v552_v14, %v551_v27 }
 0x178   : >> { %v557_v16 = vstv %s2537_s4  ;;  %v556_v28 = vmul.f32 %v555_v15, %v519_v17  ;;  %s2543_s1 = sld [smem:[#allocation63_spill]]  ;;  %v2075_v41 = vmax.f32 %v543_v33, 0.0  ;;  %v2077_v42 = vmax.f32 %v548_v34, 0.0 }
 0x179   : >> { %v562_v19 = vstv %s2538_s6  ;;  %s2545_s2 = sld [smem:[#allocation83_spill]]  ;;  %v2079_v43 = vmax.f32 %v553_v35, 0.0 }
 0x17a   : >> { %v565_v20 = vstv %s2539_s14  ;;  %v558_v36 = vadd.f32 %v557_v16, %v556_v28  ;;  %s2544_s14 = sld [smem:[#allocation73_spill]]  ;;  %v563_v53 = vadd.f32 %v562_v19, %v561_v45 }
 0x17b   : >> { %s2546_s3 = sld [smem:[#allocation93_spill]]  ;;  %v566_v46 = vmul.f32 %v565_v20, %v519_v17  ;;  %v567_v47 = vstv %s2540_s10 }
 0x17c   : >> { %v2081_v44 = vmax.f32 %v558_v36, 0.0  ;;  %s2547_s4 = sld [smem:[#allocation103_spill]]  ;;  %v570_v48 = vstv %s2541_s0  ;;  %v2095_v61 = vmax.f32 %v563_v53, 0.0 }
 0x17d   : >> { %v571_v49 = vmul.f32 %v570_v48, %v2067_v37  ;;  %v572_v50 = vstv %s2542_s29  ;;  %s2548_s5 = sld [smem:[#allocation113_spill]]  ;;  %v568_v54 = vadd.f32 %v567_v47, %v566_v46 }
 0x17e   : >> { %v574_v51 = vstv %s2543_s1  ;;  %s2549_s6 = sld [smem:[#allocation123_spill]]  ;;  %v573_v55 = vmul.f32 %v572_v50, %v2069_v38 }
 0x17f   : >> { %s2550_s8 = sld [smem:[#allocation133_spill]]  ;;  %v575_v56 = vmul.f32 %v574_v51, %v2071_v39  ;;  %v578_v58 = vstv %s2545_s2  ;;  %v2097_v62 = vmax.f32 %v568_v54, 0.0 }
 0x180   : >> { %v576_v52 = vstv %s2544_s14  ;;  %s2551_s10 = sld [smem:[#allocation143_spill]]  ;;  %v579_v63 = vmul.f32 %v578_v58, %v2075_v41  ;;  %v590_v9 = vadd.f32 %v573_v55, %v571_v49 }
 0x181   : >> { %v577_v57 = vmul.f32 %v576_v52, %v2073_v40  ;;  %v580_v59 = vstv %s2546_s3  ;;  %s2552_s0 = sld [smem:[#allocation44_spill]] }
 0x182   : >> { %v582_v60 = vstv %s2547_s4  ;;  %s2553_s1 = sld [smem:[#allocation54_spill]]  ;;  %v581_v1 = vmul.f32 %v580_v59, %v2077_v42 }
 0x183   : >> { %v583_v2 = vmul.f32 %v582_v60, %v2079_v43  ;;  %v584_v3 = vstv %s2548_s5  ;;  %s2554_s29 = sld [smem:[#allocation64_spill]]  ;;  %v591_v10 = vadd.f32 %v577_v57, %v575_v56 }
 0x184   : >> { %v586_v4 = vstv %s2549_s6  ;;  %v585_v6 = vmul.f32 %v584_v3, %v2081_v44  ;;  %s2555_s2 = sld [smem:[#allocation74_spill]]  ;;  %v592_v11 = vadd.f32 %v581_v1, %v579_v63 }
 0x185   : >> { %v588_v5 = vstv %s2550_s8  ;;  %v587_v7 = vmul.f32 %v586_v4, %v2095_v61  ;;  %s2556_s3 = sld [smem:[#allocation84_spill]]  ;;  %v595_v17 = vadd.f32 %v591_v10, %v590_v9 }
 0x186   : >> { %v589_v8 = vmul.f32 %v588_v5, %v2097_v62  ;;  %s2557_s4 = sld [smem:[#allocation94_spill]]  ;;  %v599_v12 = vstv %s2551_s10  ;;  %v593_v13 = vadd.f32 %v585_v6, %v583_v2 }
 0x187   : >> { %s2558_s14 = sld [smem:[#allocation104_spill]]  ;;  %v605_v15 = vstv %s2552_s0 }
 0x188   : >> { %v594_v14 = vadd.f32 %v589_v8, %v587_v7  ;;  %v607_v16 = vstv %s2553_s1  ;;  %s2559_s6 = sld [smem:[#allocation114_spill]]  ;;  %v606_v18 = vmul.f32 %v605_v15, %v2067_v37  ;;  %v596_v21 = vadd.f32 %v593_v13, %v592_v11 }
 0x189   : >> { %s2560_s5 = sld [smem:[#allocation124_spill]]  ;;  %v608_v19 = vmul.f32 %v607_v16, %v2069_v38  ;;  %v609_v20 = vstv %s2554_s29 }
 0x18a   : >> { %s2561_s8 = sld [smem:[#allocation134_spill]]  ;;  %v610_v22 = vmul.f32 %v609_v20, %v2071_v39  ;;  %v611_v23 = vstv %s2555_s2  ;;  %v597_v29 = vadd.f32 %v596_v21, %v595_v17 }
 0x18b   : >> { %v613_v24 = vstv %s2556_s3  ;;  %v612_v25 = vmul.f32 %v611_v23, %v2073_v40  ;;  %s2562_s9 = sld [smem:[#allocation153_spill]]  ;;  %v625_v36 = vadd.f32 %v608_v19, %v606_v18 }
 0x18c   : >> { %v614_v26 = vmul.f32 %v613_v24, %v2075_v41  ;;  %v615_v27 = vstv %s2557_s4  ;;  %s2563_s10 = sld [smem:[#allocation45_spill]]  ;;  %v598_v45 = vadd.f32 %v597_v29, %v594_v14 }
 0x18d   : >> { %v617_v28 = vstv %s2558_s14  ;;  %v616_v30 = vmul.f32 %v615_v27, %v2077_v42  ;;  %s2564_s0 = sld [smem:[#allocation55_spill]]  ;;  %v626_v48 = vadd.f32 %v612_v25, %v610_v22 }
 0x18e   : >> { %v618_v31 = vmul.f32 %v617_v28, %v2079_v43  ;;  %v619_v32 = vstv %s2559_s6  ;;  %s2565_s1 = sld [smem:[#allocation65_spill]]  ;;  %v600_v51 = vadd.f32 %v599_v12, %v598_v45 }
 0x18f   : >> { %v620_v33 = vmul.f32 %v619_v32, %v2081_v44  ;;  %v621_v34 = vstv %s2560_s5  ;;  %s2566_s29 = sld [smem:[#allocation75_spill]]  ;;  %v627_v49 = vadd.f32 %v616_v30, %v614_v26  ;;  %v630_v53 = vadd.f32 %v626_v48, %v625_v36 }
 0x190   : >> { %v623_v35 = vstv %s2561_s8  ;;  %v622_v46 = vmul.f32 %v621_v34, %v2095_v61  ;;  %s2567_s2 = sld [smem:[#allocation85_spill]]  ;;  %v601_v6 = vmax.f32 %v600_v51, 0.0 }
 0x191   : >> { %v624_v47 = vmul.f32 %v623_v35, %v2097_v62  ;;  %v628_v50 = vadd.f32 %v620_v33, %v618_v31  ;;  %s2568_s3 = sld [smem:[#allocation95_spill]]  ;;  %v602_v52 = vstv %s2562_s9 }
 0x192   : >> { %v640_v54 = vstv %s2563_s10  ;;  %s2569_s4 = sld [smem:[#allocation105_spill]]  ;;  %v603_v21 = vmul.f32 %v602_v52, %v601_v6 }
 0x193   : >> { %v629_v55 = vadd.f32 %v624_v47, %v622_v46  ;;  %v631_v56 = vadd.f32 %v628_v50, %v627_v49  ;;  %v642_v57 = vstv %s2564_s0  ;;  %s2570_s14 = sld [smem:[#allocation115_spill]]  ;;  %v641_v59 = vmul.f32 %v640_v54, %v2067_v37 }
 0x194   : >> { %v644_v58 = vstv %s2565_s1  ;;  %s2571_s6 = sld [smem:[#allocation125_spill]]  ;;  %v643_v60 = vmul.f32 %v642_v57, %v2069_v38 }
 0x195   : >> { %s2572_s5 = sld [smem:[#allocation144_spill]]  ;;  %v645_v63 = vmul.f32 %v644_v58, %v2071_v39  ;;  %v646_v1 = vstv %s2566_s29  ;;  %v632_v2 = vadd.f32 %v631_v56, %v630_v53 }
 0x196   : >> { %s2573_s8 = sld [smem:[#allocation135_spill]]  ;;  %v647_v3 = vmul.f32 %v646_v1, %v2073_v40  ;;  %v648_v4 = vstv %s2567_s2  ;;  %v660_v19 = vadd.f32 %v643_v60, %v641_v59 }
 0x197   : >> { %v650_v5 = vstv %s2568_s3  ;;  %s2574_s10 = sld [smem:[#allocation154_spill]]  ;;  %v649_v7 = vmul.f32 %v648_v4, %v2075_v41  ;;  %v633_v10 = vadd.f32 %v632_v2, %v629_v55 }
 0x198   : >> { %v651_v8 = vmul.f32 %v650_v5, %v2077_v42  ;;  %v652_v9 = vstv %s2569_s4  ;;  %s2575_s0 = sld [smem:[#allocation145_spill]]  ;;  %v661_v20 = vadd.f32 %v647_v3, %v645_v63  ;;  %v604_v63 = vadd.f32 %v603_v21, %v510_v0 }
 0x199   : >> { %v653_v11 = vmul.f32 %v652_v9, %v2079_v43  ;;  %v654_v12 = vstv %s2570_s14  ;;  %s2576_s1 = sld [smem:[#allocation46_spill]] }
 0x19a   : >> { %v656_v13 = vstv %s2571_s6  ;;  %v655_v15 = vmul.f32 %v654_v12, %v2081_v44  ;;  %s2577_s29 = sld [smem:[#allocation56_spill]]  ;;  %v662_v23 = vadd.f32 %v651_v8, %v649_v7  ;;  %v665_v26 = vadd.f32 %v661_v20, %v660_v19 }
 0x19b   : >> { %v634_v14 = vstv %s2572_s5  ;;  %v657_v16 = vmul.f32 %v656_v13, %v2095_v61  ;;  %s2578_s2 = sld [smem:[#allocation66_spill]] }
 0x19c   : >> { %v658_v17 = vstv %s2573_s8  ;;  %s2579_s3 = sld [smem:[#allocation76_spill]]  ;;  %v663_v24 = vadd.f32 %v655_v15, %v653_v11  ;;  %v635_v25 = vadd.f32 %v634_v14, %v633_v10 }
 0x19d   : >> { %v659_v18 = vmul.f32 %v658_v17, %v2097_v62  ;;  %v637_v22 = vstv %s2574_s10  ;;  %s2580_s4 = sld [smem:[#allocation86_spill]] }
 0x19e   : >> { %s2581_s14 = sld [smem:[#allocation96_spill]]  ;;  %v669_v27 = vstv %s2575_s0  ;;  %v666_v30 = vadd.f32 %v663_v24, %v662_v23  ;;  %v636_v49 = vmax.f32 %v635_v25, 0.0 }
 0x19f   : >> { %v675_v28 = vstv %s2576_s1  ;;  %s2582_s6 = sld [smem:[#allocation106_spill]]  ;;  %v664_v29 = vadd.f32 %v659_v18, %v657_v16 }
 0x1a0   : >> { %v677_v31 = vstv %s2577_s29  ;;  %s2583_s5 = sld [smem:[#allocation116_spill]]  ;;  %v676_v33 = vmul.f32 %v675_v28, %v2067_v37  ;;  %v667_v45 = vadd.f32 %v666_v30, %v665_v26  ;;  %v638_v4 = vmul.f32 %v637_v22, %v636_v49 }
 0x1a1   : >> { %v679_v32 = vstv %s2578_s2  ;;  %s2584_s8 = sld [smem:[#allocation126_spill]]  ;;  %v678_v34 = vmul.f32 %v677_v31, %v2069_v38 }
 0x1a2   : >> { %v680_v35 = vmul.f32 %v679_v32, %v2071_v39  ;;  %s2585_s10 = sld [smem:[#allocation136_spill]]  ;;  %v681_v36 = vstv %s2579_s3  ;;  %v668_v53 = vadd.f32 %v667_v45, %v664_v29 }
 0x1a3   : >> { %v682_v46 = vmul.f32 %v681_v36, %v2073_v40  ;;  %v683_v47 = vstv %s2580_s4  ;;  %s2586_s0 = sld [smem:[#allocation155_spill]]  ;;  %v695_v60 = vadd.f32 %v678_v34, %v676_v33  ;;  %v639_v36 = vadd.f32 %v638_v4, %v604_v63 }
 0x1a4   : >> { %v685_v48 = vstv %s2581_s14  ;;  %v684_v50 = vmul.f32 %v683_v47, %v2075_v41  ;;  %s2587_s1 = sld [smem:[#allocation47_spill]]  ;;  %v670_v8 = vadd.f32 %v669_v27, %v668_v53 }
 0x1a5   : >> { %v686_v51 = vmul.f32 %v685_v48, %v2077_v42  ;;  %v687_v52 = vstv %s2582_s6  ;;  %s2588_s29 = sld [smem:[#allocation146_spill]]  ;;  %v696_v2 = vadd.f32 %v682_v46, %v680_v35 }
 0x1a6   : >> { %v688_v54 = vmul.f32 %v687_v52, %v2079_v43  ;;  %v689_v55 = vstv %s2583_s5  ;;  %s2589_s2 = sld [smem:[#allocation57_spill]]  ;;  %v671_v24 = vmax.f32 %v670_v8, 0.0 }
 0x1a7   : >> { %v691_v56 = vstv %s2584_s8  ;;  %v690_v57 = vmul.f32 %v689_v55, %v2081_v44  ;;  %s2590_s3 = sld [smem:[#allocation67_spill]]  ;;  %v697_v3 = vadd.f32 %v686_v51, %v684_v50  ;;  %v700_v10 = vadd.f32 %v696_v2, %v695_v60 }
 0x1a8   : >> { %v692_v58 = vmul.f32 %v691_v56, %v2095_v61  ;;  %v693_v59 = vstv %s2585_s10  ;;  %s2591_s4 = sld [smem:[#allocation77_spill]] }
 0x1a9   : >> { %v694_v1 = vmul.f32 %v693_v59, %v2097_v62  ;;  %v672_v5 = vstv %s2586_s0  ;;  %s2592_s14 = sld [smem:[#allocation87_spill]]  ;;  %v698_v6 = vadd.f32 %v690_v57, %v688_v54 }
 0x1aa   : >> { %s2593_s6 = sld [smem:[#allocation97_spill]]  ;;  %v710_v7 = vstv %s2587_s1  ;;  %v673_v48 = vmul.f32 %v672_v5, %v671_v24  ;;  %v742_v24 = vstv %s2020_s26 }
 0x1ab   : >> { %s2594_s5 = sld [smem:[#allocation107_spill]]  ;;  %v699_v9 = vadd.f32 %v694_v1, %v692_v58  ;;  %v704_v11 = vstv %s2588_s29  ;;  %v701_v12 = vadd.f32 %v698_v6, %v697_v3  ;;  %v711_v16 = vmul.f32 %v710_v7, %v2067_v37 }
 0x1ac   : >> { %v712_v13 = vstv %s2589_s2  ;;  %s2595_s8 = sld [smem:[#allocation117_spill]] }
 0x1ad   : >> { %v714_v14 = vstv %s2590_s3  ;;  %s2596_s10 = sld [smem:[#allocation127_spill]]  ;;  %v713_v17 = vmul.f32 %v712_v13, %v2069_v38  ;;  %v702_v20 = vadd.f32 %v701_v12, %v700_v10 }
 0x1ae   : >> { %v716_v15 = vstv %s2591_s4  ;;  %s2597_s9 = sld [smem:[#allocation137_spill]]  ;;  %v715_v18 = vmul.f32 %v714_v14, %v2071_v39 }
 0x1af   : >> { %v717_v19 = vmul.f32 %v716_v15, %v2073_v40  ;;  %v718_v21 = vstv %s2592_s14  ;;  %s2598_s0 = sld [smem:[#allocation156_spill]]  ;;  %v703_v28 = vadd.f32 %v702_v20, %v699_v9  ;;  %v730_v35 = vadd.f32 %v713_v17, %v711_v16 }
 0x1b0   : >> { %v720_v22 = vstv %s2593_s6  ;;  %v719_v25 = vmul.f32 %v718_v21, %v2075_v41  ;;  %s2599_s1 = sld [smem:[#allocation48_spill]] }
 0x1b1   : >> { %v722_v23 = vstv %s2594_s5  ;;  %v721_v26 = vmul.f32 %v720_v22, %v2077_v42  ;;  %s2600_s29 = sld [smem:[#allocation147_spill]]  ;;  %v731_v46 = vadd.f32 %v717_v19, %v715_v18  ;;  %v705_v49 = vadd.f32 %v704_v11, %v703_v28 }
 0x1b2   : >> { %v723_v27 = vmul.f32 %v722_v23, %v2079_v43  ;;  %v724_v29 = vstv %s2595_s8  ;;  %s2601_s2 = sld [smem:[#allocation58_spill]]  ;;  %v674_v19 = vadd.f32 %v673_v48, %v639_v36 }
 0x1b3   : >> { %v726_v30 = vstv %s2596_s10  ;;  %v725_v32 = vmul.f32 %v724_v29, %v2081_v44  ;;  %s2602_s3 = sld [smem:[#allocation68_spill]]  ;;  %v732_v47 = vadd.f32 %v721_v26, %v719_v25  ;;  %v735_v53 = vadd.f32 %v731_v46, %v730_v35 }
 0x1b4   : >> { %v728_v31 = vstv %s2597_s9  ;;  %v727_v33 = vmul.f32 %v726_v30, %v2095_v61  ;;  %s2603_s4 = sld [smem:[#allocation78_spill]]  ;;  %v706_v7 = vmax.f32 %v705_v49, 0.0 }
 0x1b5   : >> { %v729_v34 = vmul.f32 %v728_v31, %v2097_v62  ;;  %v707_v45 = vstv %s2598_s0  ;;  %s2604_s14 = sld [smem:[#allocation88_spill]]  ;;  %v733_v50 = vadd.f32 %v725_v32, %v723_v27 }
 0x1b6   : >> { %s2605_s6 = sld [smem:[#allocation98_spill]]  ;;  %v745_v51 = vstv %s2599_s1  ;;  %v708_v23 = vmul.f32 %v707_v45, %v706_v7 }
 0x1b7   : >> { %s2606_s9 = sld [smem:[#allocation108_spill]]  ;;  %v734_v52 = vadd.f32 %v729_v34, %v727_v33  ;;  %v739_v54 = vstv %s2600_s29  ;;  %v736_v56 = vadd.f32 %v733_v50, %v732_v47  ;;  %v746_v57 = vmul.f32 %v745_v51, %v2067_v37 }
 0x1b8   : >> { %v747_v55 = vstv %s2601_s2  ;;  %s2607_s5 = sld [smem:[#allocation118_spill]] }
 0x1b9   : >> { %v749_v58 = vstv %s2602_s3  ;;  %s2608_s8 = sld [smem:[#allocation128_spill]]  ;;  %v748_v60 = vmul.f32 %v747_v55, %v2069_v38  ;;  %v737_v3 = vadd.f32 %v736_v56, %v735_v53 }
 0x1ba   : >> { %v751_v59 = vstv %s2603_s4  ;;  %s2609_s10 = sld [smem:[#allocation138_spill]]  ;;  %v750_v63 = vmul.f32 %v749_v58, %v2071_v39 }
 0x1bb   : >> { %v752_v1 = vmul.f32 %v751_v59, %v2073_v40  ;;  %v753_v2 = vstv %s2604_s14  ;;  %s2610_s0 = sld [smem:[#allocation49_spill]]  ;;  %v738_v11 = vadd.f32 %v737_v3, %v734_v52  ;;  %v765_v17 = vadd.f32 %v748_v60, %v746_v57 }
 0x1bc   : >> { %v754_v4 = vmul.f32 %v753_v2, %v2075_v41  ;;  %v755_v5 = vstv %s2605_s6  ;;  %s2611_s1 = sld [smem:[#allocation59_spill]]  ;;  %v709_v59 = vadd.f32 %v708_v23, %v674_v19  ;;  %v777_v3 = vstv %s2022_s7 }
 0x1bd   : >> { %v757_v6 = vstv %s2606_s9  ;;  %v756_v8 = vmul.f32 %v755_v5, %v2077_v42  ;;  %s2612_s29 = sld [smem:[#allocation69_spill]]  ;;  %v766_v18 = vadd.f32 %v752_v1, %v750_v63  ;;  %v740_v20 = vadd.f32 %v739_v54, %v738_v11 }
 0x1be   : >> { %v758_v9 = vmul.f32 %v757_v6, %v2079_v43  ;;  %v759_v10 = vstv %s2607_s5  ;;  %s2613_s2 = sld [smem:[#allocation79_spill]] }
 0x1bf   : >> { %v760_v12 = vmul.f32 %v759_v10, %v2081_v44  ;;  %v761_v13 = vstv %s2608_s8  ;;  %s2614_s3 = sld [smem:[#allocation89_spill]]  ;;  %v767_v21 = vadd.f32 %v756_v8, %v754_v4  ;;  %v770_v25 = vadd.f32 %v766_v18, %v765_v17 }
 0x1c0   : >> { %v763_v14 = vstv %s2609_s10  ;;  %v762_v15 = vmul.f32 %v761_v13, %v2095_v61  ;;  %s2615_s4 = sld [smem:[#allocation99_spill]]  ;;  %v741_v35 = vmax.f32 %v740_v20, 0.0 }
 0x1c1   : >> { %v764_v16 = vmul.f32 %v763_v14, %v2097_v62  ;;  %v768_v22 = vadd.f32 %v760_v12, %v758_v9  ;;  %s2616_s14 = sld [smem:[#allocation109_spill]]  ;;  %v780_v26 = vstv %s2610_s0 }
 0x1c2   : >> { %s2617_s6 = sld [smem:[#allocation119_spill]]  ;;  %v781_v29 = vmul.f32 %v780_v26, %v2067_v37  ;;  %v782_v30 = vstv %s2611_s1  ;;  %v743_v2 = vmul.f32 %v742_v24, %v741_v35 }
 0x1c3   : >> { %v769_v27 = vadd.f32 %v764_v16, %v762_v15  ;;  %v771_v28 = vadd.f32 %v768_v22, %v767_v21  ;;  %s2618_s9 = sld [smem:[#allocation148_spill]]  ;;  %v783_v31 = vmul.f32 %v782_v30, %v2069_v38  ;;  %v784_v32 = vstv %s2612_s29 }
 0x1c4   : >> { %s2619_s5 = sld [smem:[#allocation129_spill]]  ;;  %v786_v33 = vstv %s2613_s2  ;;  %v785_v45 = vmul.f32 %v784_v32, %v2071_v39 }
 0x1c5   : >> { %s2620_s8 = sld [smem:[#allocation139_spill]]  ;;  %v788_v34 = vstv %s2614_s3  ;;  %v772_v36 = vadd.f32 %v771_v28, %v770_v25  ;;  %v787_v46 = vmul.f32 %v786_v33, %v2073_v40  ;;  %v800_v58 = vadd.f32 %v783_v31, %v781_v29 }
 0x1c6   : >> { %v789_v47 = vmul.f32 %v788_v34, %v2075_v41  ;;  %v790_v48 = vstv %s2615_s4  ;;  %s2621_s10 = sld [smem:[#allocation149_spill]]  ;;  %v744_v34 = vadd.f32 %v743_v2, %v709_v59 }
 0x1c7   : >> { %v792_v49 = vstv %s2616_s14  ;;  %v773_v51 = vadd.f32 %v772_v36, %v769_v27  ;;  %v791_v53 = vmul.f32 %v790_v48, %v2077_v42  ;;  %s2622_s0 = sld [smem:[#allocation50_spill]]  ;;  %v801_v1 = vadd.f32 %v787_v46, %v785_v45 }
 0x1c8   : >> { %v794_v50 = vstv %s2617_s6  ;;  %v793_v54 = vmul.f32 %v792_v49, %v2079_v43  ;;  %s2623_s1 = sld [smem:[#allocation60_spill]] }
 0x1c9   : >> { %v774_v52 = vstv %s2618_s9  ;;  %v795_v55 = vmul.f32 %v794_v50, %v2081_v44  ;;  %s2624_s29 = sld [smem:[#allocation70_spill]]  ;;  %v802_v4 = vadd.f32 %v791_v53, %v789_v47  ;;  %v805_v7 = vadd.f32 %v801_v1, %v800_v58 }
 0x1ca   : >> { %v796_v56 = vstv %s2619_s5  ;;  %s2625_s2 = sld [smem:[#allocation80_spill]]  ;;  %v775_v6 = vadd.f32 %v774_v52, %v773_v51  ;;  %v812_v47 = vstv %s2024_s19 }
 0x1cb   : >> { %v798_v57 = vstv %s2620_s8  ;;  %v797_v60 = vmul.f32 %v796_v56, %v2095_v61  ;;  %s2626_s3 = sld [smem:[#allocation90_spill]]  ;;  %v803_v5 = vadd.f32 %v795_v55, %v793_v54 }
 0x1cc   : >> { %v799_v63 = vmul.f32 %v798_v57, %v2097_v62  ;;  %s2627_s4 = sld [smem:[#allocation100_spill]]  ;;  %v809_v8 = vstv %s2621_s10  ;;  %v776_v22 = vmax.f32 %v775_v6, 0.0 }
 0x1cd   : >> { %v815_v9 = vstv %s2622_s0  ;;  %s2628_s14 = sld [smem:[#allocation110_spill]]  ;;  %v806_v11 = vadd.f32 %v803_v5, %v802_v4 }
 0x1ce   : >> { %v804_v10 = vadd.f32 %v799_v63, %v797_v60  ;;  %v817_v12 = vstv %s2623_s1  ;;  %s2629_s6 = sld [smem:[#allocation120_spill]]  ;;  %v816_v14 = vmul.f32 %v815_v9, %v2067_v37  ;;  %v778_v46 = vmul.f32 %v777_v3, %v776_v22 }
 0x1cf   : >> { %v819_v13 = vstv %s2624_s29  ;;  %s2630_s9 = sld [smem:[#allocation130_spill]]  ;;  %v818_v15 = vmul.f32 %v817_v12, %v2069_v38  ;;  %v807_v18 = vadd.f32 %v806_v11, %v805_v7 }
 0x1d0   : >> { %v820_v16 = vmul.f32 %v819_v13, %v2071_v39  ;;  %s2631_s5 = sld [smem:[#allocation140_spill]]  ;;  %v821_v17 = vstv %s2625_s2 }
 0x1d1   : >> { %v822_v19 = vmul.f32 %v821_v17, %v2073_v40  ;;  %v823_v20 = vstv %s2626_s3  ;;  %s2632_s8 = sld [smem:[#allocation51_spill]]  ;;  %v808_v26 = vadd.f32 %v807_v18, %v804_v10  ;;  %v835_v33 = vadd.f32 %v818_v15, %v816_v14 }
 0x1d2   : >> { %v825_v21 = vstv %s2627_s4  ;;  %v824_v23 = vmul.f32 %v823_v20, %v2075_v41  ;;  %s2633_s10 = sld [smem:[#allocation150_spill]]  ;;  %v779_v17 = vadd.f32 %v778_v46, %v744_v34  ;;  %v847_v18 = vstv %s2026_s27 }
 0x1d3   : >> { %v826_v24 = vmul.f32 %v825_v21, %v2077_v42  ;;  %v827_v25 = vstv %s2628_s14  ;;  %s2634_s0 = sld [smem:[#allocation61_spill]]  ;;  %v836_v36 = vadd.f32 %v822_v19, %v820_v16  ;;  %v810_v50 = vadd.f32 %v809_v8, %v808_v26 }
 0x1d4   : >> { %v828_v27 = vmul.f32 %v827_v25, %v2079_v43  ;;  %v829_v28 = vstv %s2629_s6  ;;  %s2635_s1 = sld [smem:[#allocation71_spill]] }
 0x1d5   : >> { %v831_v29 = vstv %s2630_s9  ;;  %v830_v30 = vmul.f32 %v829_v28, %v2081_v44  ;;  %s2636_s29 = sld [smem:[#allocation81_spill]]  ;;  %v837_v45 = vadd.f32 %v826_v24, %v824_v23  ;;  %v840_v52 = vadd.f32 %v836_v36, %v835_v33 }
 0x1d6   : >> { %v832_v31 = vmul.f32 %v831_v29, %v2095_v61  ;;  %v833_v32 = vstv %s2631_s5  ;;  %s2637_s2 = sld [smem:[#allocation91_spill]]  ;;  %v811_v5 = vmax.f32 %v810_v50, 0.0 }
 0x1d7   : >> { %v834_v35 = vmul.f32 %v833_v32, %v2097_v62  ;;  %v838_v48 = vadd.f32 %v830_v30, %v828_v27  ;;  %s2638_s3 = sld [smem:[#allocation101_spill]]  ;;  %v850_v49 = vstv %s2632_s8 }
 0x1d8   : >> { %s2639_s4 = sld [smem:[#allocation111_spill]]  ;;  %v844_v53 = vstv %s2633_s10  ;;  %v851_v58 = vmul.f32 %v850_v49, %v2067_v37  ;;  %v813_v21 = vmul.f32 %v812_v47, %v811_v5 }
 0x1d9   : >> { %v839_v51 = vadd.f32 %v834_v35, %v832_v31  ;;  %v841_v54 = vadd.f32 %v838_v48, %v837_v45  ;;  %v852_v55 = vstv %s2634_s0  ;;  %s2640_s14 = sld [smem:[#allocation121_spill]] }
 0x1da   : >> { %v854_v56 = vstv %s2635_s1  ;;  %s2641_s6 = sld [smem:[#allocation131_spill]]  ;;  %v853_v59 = vmul.f32 %v852_v55, %v2069_v38 }
 0x1db   : >> { %v856_v57 = vstv %s2636_s29  ;;  %s2642_s9 = sld [smem:[#allocation141_spill]]  ;;  %v855_v60 = vmul.f32 %v854_v56, %v2071_v39  ;;  %v842_v1 = vadd.f32 %v841_v54, %v840_v52 }
 0x1dc   : >> { %v857_v63 = vmul.f32 %v856_v57, %v2073_v40  ;;  %v858_v2 = vstv %s2637_s2  ;;  %s2643_s5 = sld [smem:[#allocation52_spill]]  ;;  %v870_v16 = vadd.f32 %v853_v59, %v851_v58  ;;  %v814_v58 = vadd.f32 %v813_v21, %v779_v17 }
 0x1dd   : >> { %v860_v3 = vstv %s2638_s3  ;;  %v859_v6 = vmul.f32 %v858_v2, %v2075_v41  ;;  %v843_v9 = vadd.f32 %v842_v1, %v839_v51  ;;  %s2644_s8 = sld [smem:[#allocation151_spill]]  ;;  %v882_v1 = vstv %s2028_s17 }
 0x1de   : >> { %v862_v4 = vstv %s2639_s4  ;;  %v861_v7 = vmul.f32 %v860_v3, %v2077_v42  ;;  %s2645_s10 = sld [smem:[#allocation62_spill]]  ;;  %v871_v19 = vadd.f32 %v857_v63, %v855_v60 }
 0x1df   : >> { %v863_v8 = vmul.f32 %v862_v4, %v2079_v43  ;;  %v864_v10 = vstv %s2640_s14  ;;  %s2646_s0 = sld [smem:[#allocation72_spill]]  ;;  %v845_v22 = vadd.f32 %v844_v53, %v843_v9 }
 0x1e0   : >> { %v866_v11 = vstv %s2641_s6  ;;  %v865_v13 = vmul.f32 %v864_v10, %v2081_v44  ;;  %s2647_s1 = sld [smem:[#allocation82_spill]]  ;;  %v872_v20 = vadd.f32 %v861_v7, %v859_v6  ;;  %v875_v26 = vadd.f32 %v871_v19, %v870_v16 }
 0x1e1   : >> { %v868_v12 = vstv %s2642_s9  ;;  %v867_v14 = vmul.f32 %v866_v11, %v2095_v61  ;;  %s2648_s29 = sld [smem:[#allocation92_spill]]  ;;  %v846_v49 = vmax.f32 %v845_v22, 0.0  ;;  %v917_v6 = vstv %s2030_s18 }
 0x1e2   : >> { %v869_v15 = vmul.f32 %v868_v12, %v2097_v62  ;;  %v873_v23 = vadd.f32 %v865_v13, %v863_v8  ;;  %s2649_s2 = sld [smem:[#allocation102_spill]]  ;;  %v885_v24 = vstv %s2643_s5 }
 0x1e3   : >> { %s2650_s3 = sld [smem:[#allocation112_spill]]  ;;  %v879_v27 = vstv %s2644_s8  ;;  %v886_v30 = vmul.f32 %v885_v24, %v2067_v37  ;;  %v848_v59 = vmul.f32 %v847_v18, %v846_v49  ;;  %s2656_s8 = sshll.u32 %s1543_s21, 3 }
 0x1e4   : >> { %v874_v25 = vadd.f32 %v869_v15, %v867_v14  ;;  %v887_v28 = vstv %s2645_s10  ;;  %s2651_s4 = sld [smem:[#allocation122_spill]]  ;;  %v876_v29 = vadd.f32 %v873_v23, %v872_v20  ;;  %s516_s21 = sadd.s32 1, %s1543_s21  }
 0x1e5   : >> { %v889_v31 = vstv %s2646_s0  ;;  %s2652_s14 = sld [smem:[#allocation132_spill]]  ;;  %v888_v33 = vmul.f32 %v887_v28, %v2069_v38  ;;  %p513_p1 = scmp.ge.s32.totalorder %s516_s21, 2  }
 0x1e6   : >> { %v891_v32 = vstv %s2647_s1  ;;  %s2653_s6 = sld [smem:[#allocation142_spill]]  ;;  %v890_v34 = vmul.f32 %v889_v31, %v2071_v39  ;;  %v877_v45 = vadd.f32 %v876_v29, %v875_v26 }
 0x1e7   : >> { %v892_v35 = vmul.f32 %v891_v32, %v2073_v40  ;;  %v893_v36 = vstv %s2648_s29  ;;  %s2654_s9 = sld [smem:[#allocation152_spill]] }
 0x1e8   : >> { %v894_v46 = vmul.f32 %v893_v36, %v2075_v41  ;;  %v895_v47 = vstv %s2649_s2  ;;  %v878_v52 = vadd.f32 %v877_v45, %v874_v25  ;;  %v905_v41 = vadd.f32 %v888_v33, %v886_v30  ;;  %s2655_s5 = sld [smem:[#allocation157_spill]] }
 0x1e9   : >> { %v897_v48 = vstv %s2650_s3  ;;  %v896_v50 = vmul.f32 %v895_v47, %v2077_v42  ;;  %v906_v55 = vadd.f32 %v892_v35, %v890_v34  ;;  %s2657_s0 = sld [smem:[#allocation27_spill]] (%p513_p1) }
 0x1ea   : >> { %v898_v37 = vmul.f32 %v897_v48, %v2079_v43  ;;  %v899_v51 = vstv %s2651_s4  ;;  %v880_v56 = vadd.f32 %v879_v27, %v878_v52  ;;  %s2658_s1 = sld [smem:[#allocation157_spill]] (%p513_p1) }
 0x1eb   : >> { %v900_v53 = vmul.f32 %v899_v51, %v2081_v44  ;;  %v901_v38 = vstv %s2652_s14  ;;  %v907_v57 = vadd.f32 %v896_v50, %v894_v46  ;;  %v910_v43 = vadd.f32 %v906_v55, %v905_v41  ;;  %s2659_s29 = sld [smem:[#allocation32_spill]] (%p513_p1) }
 0x1ec   : >> { %v903_v39 = vstv %s2653_s6  ;;  %v902_v40 = vmul.f32 %v901_v38, %v2095_v61  ;;  %v881_v44 = vmax.f32 %v880_v56, 0.0  ;;  %v849_v61 = vadd.f32 %v848_v59, %v814_v58  ;;  %s2661_s6 = sld [smem:[#allocation164_spill]] (%p513_p1) }
 0x1ed   : >> { %v904_v54 = vmul.f32 %v903_v39, %v2097_v62  ;;  %v908_v42 = vadd.f32 %v900_v53, %v898_v37  ;;  %v914_v3 = vstv %s2654_s9 }
 0x1ee   : >> { %v883_v4 = vmul.f32 %v882_v1, %v881_v44  ;;  %s920_s10 = scalar_lea.vmem %s2655_s5, %s2656_s8 }
 0x1ef   : >> { %v909_v60 = vadd.f32 %v904_v54, %v902_v40  ;;  %v911_v63 = vadd.f32 %v908_v42, %v907_v57  ;;  %s1234_s3 = sshll.u32 (%p513_p1), %s2657_s0, 4 }
 0x1f0   : >> { %v884_v7 = vadd.f32 %v883_v4, %v849_v61  ;;  %s935_s5 = sshll.u32 (%p513_p1), %s2658_s1, 4  ;;  %s936_s5 = int_to_ptr.vmem [resolvable:$true] %s935_s5 }
 0x1f1   : >> { %v912_v2 = vadd.f32 %v911_v63, %v910_v43 }
 0x1f2   : > { %s934_s9 = scalar_lea.hbm (%p513_p1), %s2661_s6, %s1234_s3  ;;  %s1469_s28 = scalar_lea.hbm (%p513_p1), %s2661_s6, 32 }
 0x1f3   : >> { %v913_v62 = vadd.f32 %v912_v2, %v909_v60  ;;  %s937_s8 = sshll.u32 (%p513_p1), %s934_s9, 4  ;;  %s938_s8 = int_to_ptr.hbm [resolvable:$true] %s937_s8 }
 0x1f4   : > { %s1463_s21 = sshra.s32 (%p513_p1), %s938_s8, 4  ;;  %s1464_s21 = int_to_ptr.hbm [resolvable:$true] %s1463_s21 }
 0x1f5   : >> { %v915_v5 = vadd.f32 %v914_v3, %v913_v62  ;;  %s1465_s7 = scalar_lea.hbm (%p513_p1), %s1464_s21, 16  ;;  %p1470_p8 = scmp.lt.s32.totalorder (%p513_p1), %s1464_s21, %s2661_s6 }
 0x1f6   : > { %p1466_p3 = scmp.ne.s32.totalorder (%p513_p1), %s1464_s21, %s1465_s7  ;;  %p1471_p7 = scmp.lt.s32.totalorder (%p513_p1), %s1469_s28, %s1465_s7 }
 0x1f7   : >> { %v916_v8 = vmax.f32 %v915_v5, 0.0 }
 0x1f8   : > { %p1467_p4 = pnand (%p513_p1), %p1466_p3, %p1686_p13  ;;  %p1472_p9 = por (%p513_p1), %p1471_p7, %p1470_p8 }
 0x1f9   : >> { %v918_v9 = vmul.f32 %v917_v6, %v916_v8  ;;  %515 = sbr.rel (!%p513_p1) target bundleno = 364 (0x16c), region = 124 }
 0x1fa   : > { %p1468_p12 = pneg (%p513_p1), %p1467_p4 }
 0x1fb   : >> { %v919_v10 = vadd.f32 %v918_v9, %v884_v7 }
 0x1fc   : > { %p1473_p10 = pnand (%p513_p1), %p1472_p9, %p1468_p12 }
 0x1fd   : >> { %921 = vst [vmem:[%s920_s10] sm:$0xff] %v919_v10  ;;  %s923_s10 = scalar_lea.sflag (%p513_p1), [#allocation5], %s2659_s29 }
 0x1fe   : > { %1476 = shalt.err (!%p1473_p10)
}
 0x1ff   : > { %s1552_s24 = smov 128   ;;  %s1553_s11 = smov 8  }
 0x200   : > { %1257 = dma.vmem_to_hbm [thread:$0]  (%p1686_p13), %s936_s5, 256, %s938_s8, %s923_s10, %s1552_s24, %s1552_s24, %s1553_s11  }
 0x201 PF: > { %s2662_s15 = sld [smem:[#allocation23_spill]] }
 0x202   : > { %s2664_s16 = sld [smem:[#allocation26_spill]] }
 0x207   : > { %s952_s23 = sand.u32 1, %s2662_s15  }
 0x208   : > { %p2665_p11 = scmp.ge.s32.totalorder %s2664_s16, 2  ;;  %s953_s22 = scalar_lea.sflag [#allocation5], %s952_s23 }
 0x20a   : > { %p1280_p0 = pnand %p2665_p11, %p1691_p5 }
 0x20c   : > { %p1281_p2 = pneg %p1280_p0 }
 0x20e   : > { %1522 = dma.done.wait (%p1281_p2), %s953_s22, 256  }
 0x20f   : > { %1524 = vsyncadd (%p1281_p2), %s953_s22, 4294967040  ;;  %s2666_s29 = sld [smem:[#allocation28_spill]] }
 0x210   : > { %s2667_s26 = sld [smem:[#allocation24_spill]] }
 0x211   : > { %s2668_s27 = sld [smem:[#allocation25_spill]] }
 0x212   : > { %s2669_s28 = sld [smem:[#allocation29_spill]] }
 0x215   : > { %p25_p6 = scmp.ge.s32.totalorder %s2666_s29, 4  }
 0x217   :  { %27 = sbr.rel (!%p25_p6) target bundleno = 18 (0x12), region = 135 }
 0x21c   :  { %959 = vsyncpa [#allocation4], 1 }
 0x21d   :  { %961 = vsyncpa [#allocation4 + $0x1], 1 }
 0x21e   :  { %962 = vsyncpa [#allocation5], 1 }
 0x21f   :  { %964 = vsyncpa [#allocation5 + $0x1], 1 }
 0x220   :  { %965 = vsyncpa [#allocation6], 1 }
 0x221   :  { %967 = vsyncpa [#allocation6 + $0x1], 1 }
 0x222   :  { %968 = vsyncpa [#allocation7], 1 }
 0x223   :  { %970 = vsyncpa [#allocation7 + $0x1], 1 }
 0x224   :  { %971 = vsyncpa [#allocation9], 1 }
 0x225   :  { %972 = vsyncpa [#allocation13], 1 }

</bundles_post_ra>
